<compile_context>
chip_gen: v7x
topology: tpu7x:2x2x1
jax: 0.10.0
libtpu: 0.0.40
codegen_flags: <defaults>
</compile_context>

<pallas_src>
import numpy as np
import jax
import jax.numpy as jnp
from jax import lax
from jax.experimental import pallas as pl
from jax.experimental.pallas import tpu as pltpu

EPS = 1e-5


# ----------------------------- kernel helpers -------------------------------
def _bn_act(y, gamma, beta, fold, expand, inv_p, relu):
    """Single-pass training-mode BatchNorm (+ optional ReLU) in band layout.

    y      : (R, L*C) f32 activations; channel c of lane group l at lane l*C+c
    gamma  : (1, C), beta: (1, C)
    fold   : (L*C, C)  0/1 matrix summing the L lane groups per channel
    expand : (C, L*C)  0/1 matrix broadcasting per-channel values back to lanes
    """
    colsum = jnp.sum(y, axis=0, keepdims=True)                 # (1, L*C)
    colsq = jnp.sum(y * y, axis=0, keepdims=True)              # (1, L*C)
    # No jnp.concatenate: four tiny 1-row dots instead of two 2-row dots on
    # 8-sublane-padded temporaries.
    mu = jnp.dot(colsum, fold, preferred_element_type=jnp.float32) * inv_p   # (1, C)
    ex2 = jnp.dot(colsq, fold, preferred_element_type=jnp.float32) * inv_p   # (1, C)
    var = jnp.maximum(ex2 - mu * mu, 0.0)        # biased var; guard cancellation
    scale_c = gamma * lax.rsqrt(var + EPS)                     # (1, C)  (EUP)
    shift_c = beta - mu * scale_c                              # (1, C)
    scale_l = jnp.dot(scale_c, expand, preferred_element_type=jnp.float32)   # (1, L*C)
    shift_l = jnp.dot(shift_c, expand, preferred_element_type=jnp.float32)   # (1, L*C)
    y = y * scale_l + shift_l
    return jnp.maximum(y, 0.0) if relu else y


# --------------------------------- kernel -----------------------------------
def bottleneck_kernel(x_ref, w1_ref, w2_ref, w3_ref, sp_ref, sn_ref,
                      g1_ref, b1_ref, g2_ref, b2_ref, g3_ref, b3_ref,
                      fm_ref, em_ref, fo_ref, eo_ref, out_ref):
    r = x_ref.shape[0]                        # N*H/pack band rows
    cmid = g1_ref.shape[1]
    lane_groups = fm_ref.shape[0] // cmid     # pack*W lane groups per band row
    inv_p = 1.0 / float(r * lane_groups)      # == 1/(N*H*W)  BN sample count
    mxu = w1_ref.dtype                        # bf16 (default) or f32

    x = x_ref[...]                            # (R, PW*Cin) f32, lane-dense

    # ---- conv1 (1x1): one block-diagonal matmul + BN1 + ReLU (BN math in f32)
    y = jnp.dot(x.astype(mxu), w1_ref[...], preferred_element_type=jnp.float32)
    y = _bn_act(y, g1_ref[...], b1_ref[...], fm_ref[...], em_ref[...], inv_p, True)

    # ---- conv2 (3x3, stride 1, pad 1): kw + in-pack kh taps folded into the
    # banded weights; cross-band-row kh taps via boundary-masked (R,R) 0/1
    # shift matmuls (no concat / unaligned-slice relayouts, no VPU masking).
    # Shifted operands are prepared BEFORE the accumulating dot chain so the
    # three dots can accumulate in-place (MRB on v7x).
    y_mid = y.astype(mxu)
    y_prev = jnp.dot(sp_ref[...], y_mid,
                     preferred_element_type=jnp.float32).astype(mxu)   # band row b-1 (0 at image top)
    y_next = jnp.dot(sn_ref[...], y_mid,
                     preferred_element_type=jnp.float32).astype(mxu)   # band row b+1 (0 at image bottom)
    acc = jnp.dot(y_prev, w2_ref[0], preferred_element_type=jnp.float32)
    acc = acc + jnp.dot(y_mid, w2_ref[1], preferred_element_type=jnp.float32)
    acc = acc + jnp.dot(y_next, w2_ref[2], preferred_element_type=jnp.float32)
    y = _bn_act(acc, g2_ref[...], b2_ref[...], fm_ref[...], em_ref[...], inv_p, True)

    # ---- conv3 (1x1) block-diagonal matmul + BN3 (no ReLU yet)
    y = jnp.dot(y.astype(mxu), w3_ref[...], preferred_element_type=jnp.float32)
    y = _bn_act(y, g3_ref[...], b3_ref[...], fo_ref[...], eo_ref[...], inv_p, False)

    # ---- residual add (downsample=None => Cin == Cout, identical layout) + ReLU
    out_ref[...] = jnp.maximum(y + x, 0.0).astype(out_ref.dtype)


# -------------------------------- wrapper ------------------------------------
def _packed_conv3x3_weights(w2_oihw, width, pack):
    """Fold kw taps + within-pack kh taps of a 3x3 conv into banded weights.

    Returns (3, pack*width*Ci, pack*width*Co): taps sourced from the
    [previous, same, next] band row.  Rows falling outside [0, width) are
    dropped -> implicit zero padding in W.
    """
    co, ci = int(w2_oihw.shape[0]), int(w2_oihw.shape[1])
    mats = []
    for tgt in (-1, 0, 1):                       # previous / same / next band row
        m = jnp.zeros((pack * width * ci, pack * width * co), jnp.float32)
        for kh in range(3):
            s = np.zeros((pack, pack), np.float32)   # in-pack row coupling [ps, po]
            for po in range(pack):
                q = po + kh - 1                       # source row, pack-relative
                t = -1 if q < 0 else (1 if q >= pack else 0)
                if t == tgt:
                    s[q % pack, po] = 1.0
            if not s.any():
                continue
            for kw in range(3):
                # ones at [ws = wo + kw - 1, wo]; out-of-range rows dropped
                wshift = np.eye(width, k=1 - kw, dtype=np.float32)
                sel = np.kron(s, wshift)              # (pack*width, pack*width)
                blk = jnp.transpose(w2_oihw[:, :, kh, kw])   # (ci, co)
                m = m + jnp.kron(jnp.asarray(sel), blk)
        mats.append(m)
    return jnp.stack(mats, axis=0)


def _shift_matrices(n, rows_per_image):
    """Boundary-masked band-row shift matrices: y_prev = S_prev @ y etc."""
    rb = n * rows_per_image
    sp = np.zeros((rb, rb), np.float32)
    sn = np.zeros((rb, rb), np.float32)
    for b in range(rb):
        if b % rows_per_image > 0:
            sp[b, b - 1] = 1.0                  # previous band row (0 at image top)
        if b % rows_per_image < rows_per_image - 1:
            sn[b, b + 1] = 1.0                  # next band row (0 at image bottom)
    return sp, sn


def bottleneck_forward(x_nchw, params, *, use_bf16_mxu=True, pack=2):
    (w1_t, w2_t, w3_t, g1, b1, g2, b2, g3, b3) = params
    cmid, cin = int(w1_t.shape[0]), int(w1_t.shape[1])
    cout = int(w3_t.shape[0])
    n, _, h, w = x_nchw.shape
    assert cin == cout, "downsample=None requires in_channels == out_channels*expansion"
    if h % pack != 0:
        pack = 1
    pw = pack * w
    rpi = h // pack                            # band rows per image

    # bf16 is the native MXU dtype on v5e/v6e/v7x; f32 kept as a debug option.
    mxu_dtype = jnp.bfloat16 if use_bf16_mxu else jnp.float32

    # 1x1 convs -> block-diagonal matmuls on the packed (row, PW*C) band layout.
    # TODO(synk): kron weights are only sensible at toy W/C; see header TODO.
    w1 = jnp.transpose(w1_t.reshape(cmid, cin))                     # (cin, cmid)
    w3 = jnp.transpose(w3_t.reshape(cout, cmid))                    # (cmid, cout)
    eye_pw = jnp.eye(pw, dtype=jnp.float32)
    w1b = jnp.kron(eye_pw, w1).astype(mxu_dtype)                    # (pw*cin,  pw*cmid)
    w3b = jnp.kron(eye_pw, w3).astype(mxu_dtype)                    # (pw*cmid, pw*cout)
    w2b = _packed_conv3x3_weights(w2_t, w, pack).astype(mxu_dtype)  # (3, pw*cmid, pw*cmid)

    sp, sn = _shift_matrices(n, rpi)
    sp = jnp.asarray(sp, mxu_dtype)
    sn = jnp.asarray(sn, mxu_dtype)

    # BN channel fold / broadcast 0/1 matrices (f32: BN stats stay f32).
    fold_mid = jnp.kron(jnp.ones((pw, 1), jnp.float32), jnp.eye(cmid, dtype=jnp.float32))
    fold_out = jnp.kron(jnp.ones((pw, 1), jnp.float32), jnp.eye(cout, dtype=jnp.float32))
    exp_mid = jnp.transpose(fold_mid)
    exp_out = jnp.transpose(fold_out)

    # NCHW -> packed lane-dense band layout (N*H/pack, pack*W*Cin):
    # band row b = (n, h//pack), lane = (h%pack)*W*Cin + w*Cin + c.
    # TODO(synk): at real shapes ingest/emit NHWC (band) directly to avoid two
    # extra HBM relayout passes around the kernel.
    x2d = (jnp.transpose(x_nchw, (0, 2, 3, 1)).astype(jnp.float32)
           .reshape(n * rpi, pw * cin))

    to2d = lambda v: v.reshape(1, -1).astype(jnp.float32)

    out2d = pl.pallas_call(
        bottleneck_kernel,
        out_shape=jax.ShapeDtypeStruct((n * rpi, pw * cout), jnp.float32),
        in_specs=[pl.BlockSpec(memory_space=pltpu.MemorySpace.VMEM)] * 16,
        out_specs=pl.BlockSpec(memory_space=pltpu.MemorySpace.VMEM),
    )(x2d, w1b, w2b, w3b, sp, sn,
      to2d(g1), to2d(b1), to2d(g2), to2d(b2), to2d(g3), to2d(b3),
      fold_mid, exp_mid, fold_out, exp_out)

    return jnp.transpose(out2d.reshape(n, h, w, cout), (0, 3, 1, 2))   # -> NCHW


# ----------------------- pure-JAX reference (NCHW) ---------------------------
def _bn_ref(y, gamma, beta):
    mu = jnp.mean(y, axis=(0, 2, 3), keepdims=True)
    var = jnp.mean(jnp.square(y - mu), axis=(0, 2, 3), keepdims=True)
    g = gamma.reshape(1, -1, 1, 1)
    b = beta.reshape(1, -1, 1, 1)
    return (y - mu) * lax.rsqrt(var + EPS) * g + b


def bottleneck_ref(x, params):
    (w1, w2, w3, g1, b1, g2, b2, g3, b3) = params
    dn = ('NCHW', 'OIHW', 'NCHW')
    y = lax.conv_general_dilated(x, w1, (1, 1), 'VALID', dimension_numbers=dn)
    y = jnp.maximum(_bn_ref(y, g1, b1), 0.0)
    y = lax.conv_general_dilated(y, w2, (1, 1), ((1, 1), (1, 1)), dimension_numbers=dn)
    y = jnp.maximum(_bn_ref(y, g2, b2), 0.0)
    y = lax.conv_general_dilated(y, w3, (1, 1), 'VALID', dimension_numbers=dn)
    y = _bn_ref(y, g3, b3)
    return jnp.maximum(y + x, 0.0)


# --------------------------------- main --------------------------------------
if __name__ == "__main__":
    # Bottleneck(in_channels=16, out_channels=4, downsample=None, strides=1)
    # => residual valid since out_channels * expansion == in_channels.
    N, Cin, Hs, Ws = 2, 16, 16, 16
    Cmid = 4
    Cout = Cmid * 4  # expansion = 4

    key = jax.random.PRNGKey(0)
    ks = jax.random.split(key, 10)

    x = jax.random.normal(ks[0], (N, Cin, Hs, Ws), jnp.float32)

    w1 = 0.1 * jax.random.normal(ks[1], (Cmid, Cin, 1, 1), jnp.float32)
    w2 = 0.1 * jax.random.normal(ks[2], (Cmid, Cmid, 3, 3), jnp.float32)
    w3 = 0.1 * jax.random.normal(ks[3], (Cout, Cmid, 1, 1), jnp.float32)
    g1 = 1.0 + 0.1 * jax.random.normal(ks[4], (Cmid,), jnp.float32)
    b1 = 0.1 * jax.random.normal(ks[5], (Cmid,), jnp.float32)
    g2 = 1.0 + 0.1 * jax.random.normal(ks[6], (Cmid,), jnp.float32)
    b2 = 0.1 * jax.random.normal(ks[7], (Cmid,), jnp.float32)
    g3 = 1.0 + 0.1 * jax.random.normal(ks[8], (Cout,), jnp.float32)
    b3 = 0.1 * jax.random.normal(ks[9], (Cout,), jnp.float32)

    params = (w1, w2, w3, g1, b1, g2, b2, g3, b3)

    out = bottleneck_forward(x, params)       # bf16 MXU feeding (default)
    jax.block_until_ready(out)

    ref = bottleneck_ref(x, params)
    assert out.shape == (N, Cin, Hs, Ws)
    max_diff = float(jnp.max(jnp.abs(out - ref)))
    # bf16 MXU feeding vs an f32 reference: ~1% relative error budget.
    assert jnp.allclose(out, ref, atol=2e-2, rtol=2e-2), f"max abs diff = {max_diff}"

    print("KERNEL_OK")
</pallas_src>

<mosaic_0001>
module attributes {stable_mosaic.version = 11 : i64} {
  func.func @bottleneck_kernel(%arg0: memref<16x512xf32, #tpu.memory_space<vmem>>, %arg1: memref<512x128xbf16, #tpu.memory_space<vmem>>, %arg2: memref<3x128x128xbf16, #tpu.memory_space<vmem>>, %arg3: memref<128x512xbf16, #tpu.memory_space<vmem>>, %arg4: memref<16x16xbf16, #tpu.memory_space<vmem>>, %arg5: memref<16x16xbf16, #tpu.memory_space<vmem>>, %arg6: memref<1x4xf32, #tpu.memory_space<vmem>>, %arg7: memref<1x4xf32, #tpu.memory_space<vmem>>, %arg8: memref<1x4xf32, #tpu.memory_space<vmem>>, %arg9: memref<1x4xf32, #tpu.memory_space<vmem>>, %arg10: memref<1x16xf32, #tpu.memory_space<vmem>>, %arg11: memref<1x16xf32, #tpu.memory_space<vmem>>, %arg12: memref<128x4xf32, #tpu.memory_space<vmem>>, %arg13: memref<4x128xf32, #tpu.memory_space<vmem>>, %arg14: memref<512x16xf32, #tpu.memory_space<vmem>>, %arg15: memref<16x512xf32, #tpu.memory_space<vmem>>, %arg16: memref<16x512xf32, #tpu.memory_space<vmem>>) attributes {dimension_semantics = [], scalar_prefetch = 0 : i64, scratch_operands = 0 : i64, tpu.core_type = #tpu.core_type<tc>} {
    %c0 = arith.constant 0 : index
    %c0_0 = arith.constant 0 : index
    %0 = vector.load %arg0[%c0, %c0_0] : memref<16x512xf32, #tpu.memory_space<vmem>>, vector<16x512xf32>
    %1 = arith.truncf %0 : vector<16x512xf32> to vector<16x512xbf16>
    %c0_1 = arith.constant 0 : index
    %c0_2 = arith.constant 0 : index
    %2 = vector.load %arg1[%c0_1, %c0_2] : memref<512x128xbf16, #tpu.memory_space<vmem>>, vector<512x128xbf16>
    %cst = arith.constant dense<0.000000e+00> : vector<16x128xf32>
    %3 = tpu.matmul %1, %2, %cst {dimension_numbers = #tpu.dot_dimension_numbers<[1], [0], [0], [1], [0, 0, 1, 1], [], []>} : vector<16x512xbf16>, vector<512x128xbf16>, vector<16x128xf32> -> vector<16x128xf32>
    %c0_3 = arith.constant 0 : index
    %c0_4 = arith.constant 0 : index
    %4 = vector.load %arg6[%c0_3, %c0_4] : memref<1x4xf32, #tpu.memory_space<vmem>>, vector<1x4xf32>
    %c0_5 = arith.constant 0 : index
    %c0_6 = arith.constant 0 : index
    %5 = vector.load %arg7[%c0_5, %c0_6] : memref<1x4xf32, #tpu.memory_space<vmem>>, vector<1x4xf32>
    %c0_7 = arith.constant 0 : index
    %c0_8 = arith.constant 0 : index
    %6 = vector.load %arg12[%c0_7, %c0_8] : memref<128x4xf32, #tpu.memory_space<vmem>>, vector<128x4xf32>
    %c0_9 = arith.constant 0 : index
    %c0_10 = arith.constant 0 : index
    %7 = vector.load %arg13[%c0_9, %c0_10] : memref<4x128xf32, #tpu.memory_space<vmem>>, vector<4x128xf32>
    %cst_11 = arith.constant dense<0.000000e+00> : vector<128xf32>
    %8 = vector.multi_reduction <add>, %3, %cst_11 [0] : vector<16x128xf32> to vector<128xf32>
    %9 = vector.shape_cast %8 : vector<128xf32> to vector<1x128xf32>
    %10 = arith.mulf %3, %3 : vector<16x128xf32>
    %cst_12 = arith.constant dense<0.000000e+00> : vector<128xf32>
    %11 = vector.multi_reduction <add>, %10, %cst_12 [0] : vector<16x128xf32> to vector<128xf32>
    %12 = vector.shape_cast %11 : vector<128xf32> to vector<1x128xf32>
    %cst_13 = arith.constant dense<0.000000e+00> : vector<1x4xf32>
    %13 = tpu.matmul %9, %6, %cst_13 {dimension_numbers = #tpu.dot_dimension_numbers<[1], [0], [0], [1], [0, 0, 1, 1], [], []>} : vector<1x128xf32>, vector<128x4xf32>, vector<1x4xf32> -> vector<1x4xf32>
    %cst_14 = arith.constant 0.001953125 : f32
    %14 = vector.broadcast %cst_14 : f32 to vector<1x4xf32>
    %15 = arith.mulf %13, %14 : vector<1x4xf32>
    %cst_15 = arith.constant dense<0.000000e+00> : vector<1x4xf32>
    %16 = tpu.matmul %12, %6, %cst_15 {dimension_numbers = #tpu.dot_dimension_numbers<[1], [0], [0], [1], [0, 0, 1, 1], [], []>} : vector<1x128xf32>, vector<128x4xf32>, vector<1x4xf32> -> vector<1x4xf32>
    %cst_16 = arith.constant 0.001953125 : f32
    %17 = vector.broadcast %cst_16 : f32 to vector<1x4xf32>
    %18 = arith.mulf %16, %17 : vector<1x4xf32>
    %19 = arith.mulf %15, %15 : vector<1x4xf32>
    %20 = arith.subf %18, %19 : vector<1x4xf32>
    %cst_17 = arith.constant 0.000000e+00 : f32
    %21 = vector.broadcast %cst_17 : f32 to vector<1x4xf32>
    %22 = arith.maximumf %20, %21 : vector<1x4xf32>
    %cst_18 = arith.constant 9.99999974E-6 : f32
    %23 = vector.broadcast %cst_18 : f32 to vector<1x4xf32>
    %24 = arith.addf %22, %23 : vector<1x4xf32>
    %25 = math.rsqrt %24 : vector<1x4xf32>
    %26 = arith.mulf %4, %25 : vector<1x4xf32>
    %27 = arith.mulf %15, %26 : vector<1x4xf32>
    %28 = arith.subf %5, %27 : vector<1x4xf32>
    %cst_19 = arith.constant dense<0.000000e+00> : vector<1x128xf32>
    %29 = tpu.matmul %26, %7, %cst_19 {dimension_numbers = #tpu.dot_dimension_numbers<[1], [0], [0], [1], [0, 0, 1, 1], [], []>} : vector<1x4xf32>, vector<4x128xf32>, vector<1x128xf32> -> vector<1x128xf32>
    %cst_20 = arith.constant dense<0.000000e+00> : vector<1x128xf32>
    %30 = tpu.matmul %28, %7, %cst_20 {dimension_numbers = #tpu.dot_dimension_numbers<[1], [0], [0], [1], [0, 0, 1, 1], [], []>} : vector<1x4xf32>, vector<4x128xf32>, vector<1x128xf32> -> vector<1x128xf32>
    %31 = vector.broadcast %29 : vector<1x128xf32> to vector<16x128xf32>
    %32 = arith.mulf %3, %31 : vector<16x128xf32>
    %33 = vector.broadcast %30 : vector<1x128xf32> to vector<16x128xf32>
    %34 = arith.addf %32, %33 : vector<16x128xf32>
    %cst_21 = arith.constant 0.000000e+00 : f32
    %35 = vector.broadcast %cst_21 : f32 to vector<16x128xf32>
    %36 = arith.maximumf %34, %35 : vector<16x128xf32>
    %37 = arith.truncf %36 : vector<16x128xf32> to vector<16x128xbf16>
    %c0_22 = arith.constant 0 : index
    %c0_23 = arith.constant 0 : index
    %38 = vector.load %arg4[%c0_22, %c0_23] : memref<16x16xbf16, #tpu.memory_space<vmem>>, vector<16x16xbf16>
    %cst_24 = arith.constant dense<0.000000e+00> : vector<16x128xf32>
    %39 = tpu.matmul %38, %37, %cst_24 {dimension_numbers = #tpu.dot_dimension_numbers<[1], [0], [0], [1], [0, 0, 1, 1], [], []>} : vector<16x16xbf16>, vector<16x128xbf16>, vector<16x128xf32> -> vector<16x128xf32>
    %40 = arith.truncf %39 : vector<16x128xf32> to vector<16x128xbf16>
    %c0_25 = arith.constant 0 : index
    %c0_26 = arith.constant 0 : index
    %41 = vector.load %arg5[%c0_25, %c0_26] : memref<16x16xbf16, #tpu.memory_space<vmem>>, vector<16x16xbf16>
    %cst_27 = arith.constant dense<0.000000e+00> : vector<16x128xf32>
    %42 = tpu.matmul %41, %37, %cst_27 {dimension_numbers = #tpu.dot_dimension_numbers<[1], [0], [0], [1], [0, 0, 1, 1], [], []>} : vector<16x16xbf16>, vector<16x128xbf16>, vector<16x128xf32> -> vector<16x128xf32>
    %43 = arith.truncf %42 : vector<16x128xf32> to vector<16x128xbf16>
    %c0_28 = arith.constant 0 : index
    %c0_29 = arith.constant 0 : index
    %c0_30 = arith.constant 0 : index
    %44 = vector.load %arg2[%c0_28, %c0_29, %c0_30] : memref<3x128x128xbf16, #tpu.memory_space<vmem>>, vector<1x128x128xbf16>
    %45 = vector.shape_cast %44 : vector<1x128x128xbf16> to vector<128x128xbf16>
    %cst_31 = arith.constant dense<0.000000e+00> : vector<16x128xf32>
    %46 = tpu.matmul %40, %45, %cst_31 {dimension_numbers = #tpu.dot_dimension_numbers<[1], [0], [0], [1], [0, 0, 1, 1], [], []>} : vector<16x128xbf16>, vector<128x128xbf16>, vector<16x128xf32> -> vector<16x128xf32>
    %c1 = arith.constant 1 : index
    %c0_32 = arith.constant 0 : index
    %c0_33 = arith.constant 0 : index
    %47 = vector.load %arg2[%c1, %c0_32, %c0_33] : memref<3x128x128xbf16, #tpu.memory_space<vmem>>, vector<1x128x128xbf16>
    %48 = vector.shape_cast %47 : vector<1x128x128xbf16> to vector<128x128xbf16>
    %cst_34 = arith.constant dense<0.000000e+00> : vector<16x128xf32>
    %49 = tpu.matmul %37, %48, %cst_34 {dimension_numbers = #tpu.dot_dimension_numbers<[1], [0], [0], [1], [0, 0, 1, 1], [], []>} : vector<16x128xbf16>, vector<128x128xbf16>, vector<16x128xf32> -> vector<16x128xf32>
    %50 = arith.addf %46, %49 : vector<16x128xf32>
    %c2 = arith.constant 2 : index
    %c0_35 = arith.constant 0 : index
    %c0_36 = arith.constant 0 : index
    %51 = vector.load %arg2[%c2, %c0_35, %c0_36] : memref<3x128x128xbf16, #tpu.memory_space<vmem>>, vector<1x128x128xbf16>
    %52 = vector.shape_cast %51 : vector<1x128x128xbf16> to vector<128x128xbf16>
    %cst_37 = arith.constant dense<0.000000e+00> : vector<16x128xf32>
    %53 = tpu.matmul %43, %52, %cst_37 {dimension_numbers = #tpu.dot_dimension_numbers<[1], [0], [0], [1], [0, 0, 1, 1], [], []>} : vector<16x128xbf16>, vector<128x128xbf16>, vector<16x128xf32> -> vector<16x128xf32>
    %54 = arith.addf %50, %53 : vector<16x128xf32>
    %c0_38 = arith.constant 0 : index
    %c0_39 = arith.constant 0 : index
    %55 = vector.load %arg8[%c0_38, %c0_39] : memref<1x4xf32, #tpu.memory_space<vmem>>, vector<1x4xf32>
    %c0_40 = arith.constant 0 : index
    %c0_41 = arith.constant 0 : index
    %56 = vector.load %arg9[%c0_40, %c0_41] : memref<1x4xf32, #tpu.memory_space<vmem>>, vector<1x4xf32>
    %c0_42 = arith.constant 0 : index
    %c0_43 = arith.constant 0 : index
    %57 = vector.load %arg12[%c0_42, %c0_43] : memref<128x4xf32, #tpu.memory_space<vmem>>, vector<128x4xf32>
    %c0_44 = arith.constant 0 : index
    %c0_45 = arith.constant 0 : index
    %58 = vector.load %arg13[%c0_44, %c0_45] : memref<4x128xf32, #tpu.memory_space<vmem>>, vector<4x128xf32>
    %cst_46 = arith.constant dense<0.000000e+00> : vector<128xf32>
    %59 = vector.multi_reduction <add>, %54, %cst_46 [0] : vector<16x128xf32> to vector<128xf32>
    %60 = vector.shape_cast %59 : vector<128xf32> to vector<1x128xf32>
    %61 = arith.mulf %54, %54 : vector<16x128xf32>
    %cst_47 = arith.constant dense<0.000000e+00> : vector<128xf32>
    %62 = vector.multi_reduction <add>, %61, %cst_47 [0] : vector<16x128xf32> to vector<128xf32>
    %63 = vector.shape_cast %62 : vector<128xf32> to vector<1x128xf32>
    %cst_48 = arith.constant dense<0.000000e+00> : vector<1x4xf32>
    %64 = tpu.matmul %60, %57, %cst_48 {dimension_numbers = #tpu.dot_dimension_numbers<[1], [0], [0], [1], [0, 0, 1, 1], [], []>} : vector<1x128xf32>, vector<128x4xf32>, vector<1x4xf32> -> vector<1x4xf32>
    %cst_49 = arith.constant 0.001953125 : f32
    %65 = vector.broadcast %cst_49 : f32 to vector<1x4xf32>
    %66 = arith.mulf %64, %65 : vector<1x4xf32>
    %cst_50 = arith.constant dense<0.000000e+00> : vector<1x4xf32>
    %67 = tpu.matmul %63, %57, %cst_50 {dimension_numbers = #tpu.dot_dimension_numbers<[1], [0], [0], [1], [0, 0, 1, 1], [], []>} : vector<1x128xf32>, vector<128x4xf32>, vector<1x4xf32> -> vector<1x4xf32>
    %cst_51 = arith.constant 0.001953125 : f32
    %68 = vector.broadcast %cst_51 : f32 to vector<1x4xf32>
    %69 = arith.mulf %67, %68 : vector<1x4xf32>
    %70 = arith.mulf %66, %66 : vector<1x4xf32>
    %71 = arith.subf %69, %70 : vector<1x4xf32>
    %cst_52 = arith.constant 0.000000e+00 : f32
    %72 = vector.broadcast %cst_52 : f32 to vector<1x4xf32>
    %73 = arith.maximumf %71, %72 : vector<1x4xf32>
    %cst_53 = arith.constant 9.99999974E-6 : f32
    %74 = vector.broadcast %cst_53 : f32 to vector<1x4xf32>
    %75 = arith.addf %73, %74 : vector<1x4xf32>
    %76 = math.rsqrt %75 : vector<1x4xf32>
    %77 = arith.mulf %55, %76 : vector<1x4xf32>
    %78 = arith.mulf %66, %77 : vector<1x4xf32>
    %79 = arith.subf %56, %78 : vector<1x4xf32>
    %cst_54 = arith.constant dense<0.000000e+00> : vector<1x128xf32>
    %80 = tpu.matmul %77, %58, %cst_54 {dimension_numbers = #tpu.dot_dimension_numbers<[1], [0], [0], [1], [0, 0, 1, 1], [], []>} : vector<1x4xf32>, vector<4x128xf32>, vector<1x128xf32> -> vector<1x128xf32>
    %cst_55 = arith.constant dense<0.000000e+00> : vector<1x128xf32>
    %81 = tpu.matmul %79, %58, %cst_55 {dimension_numbers = #tpu.dot_dimension_numbers<[1], [0], [0], [1], [0, 0, 1, 1], [], []>} : vector<1x4xf32>, vector<4x128xf32>, vector<1x128xf32> -> vector<1x128xf32>
    %82 = vector.broadcast %80 : vector<1x128xf32> to vector<16x128xf32>
    %83 = arith.mulf %54, %82 : vector<16x128xf32>
    %84 = vector.broadcast %81 : vector<1x128xf32> to vector<16x128xf32>
    %85 = arith.addf %83, %84 : vector<16x128xf32>
    %cst_56 = arith.constant 0.000000e+00 : f32
    %86 = vector.broadcast %cst_56 : f32 to vector<16x128xf32>
    %87 = arith.maximumf %85, %86 : vector<16x128xf32>
    %88 = arith.truncf %87 : vector<16x128xf32> to vector<16x128xbf16>
    %c0_57 = arith.constant 0 : index
    %c0_58 = arith.constant 0 : index
    %89 = vector.load %arg3[%c0_57, %c0_58] : memref<128x512xbf16, #tpu.memory_space<vmem>>, vector<128x512xbf16>
    %cst_59 = arith.constant dense<0.000000e+00> : vector<16x512xf32>
    %90 = tpu.matmul %88, %89, %cst_59 {dimension_numbers = #tpu.dot_dimension_numbers<[1], [0], [0], [1], [0, 0, 1, 1], [], []>} : vector<16x128xbf16>, vector<128x512xbf16>, vector<16x512xf32> -> vector<16x512xf32>
    %c0_60 = arith.constant 0 : index
    %c0_61 = arith.constant 0 : index
    %91 = vector.load %arg10[%c0_60, %c0_61] : memref<1x16xf32, #tpu.memory_space<vmem>>, vector<1x16xf32>
    %c0_62 = arith.constant 0 : index
    %c0_63 = arith.constant 0 : index
    %92 = vector.load %arg11[%c0_62, %c0_63] : memref<1x16xf32, #tpu.memory_space<vmem>>, vector<1x16xf32>
    %c0_64 = arith.constant 0 : index
    %c0_65 = arith.constant 0 : index
    %93 = vector.load %arg14[%c0_64, %c0_65] : memref<512x16xf32, #tpu.memory_space<vmem>>, vector<512x16xf32>
    %c0_66 = arith.constant 0 : index
    %c0_67 = arith.constant 0 : index
    %94 = vector.load %arg15[%c0_66, %c0_67] : memref<16x512xf32, #tpu.memory_space<vmem>>, vector<16x512xf32>
    %cst_68 = arith.constant dense<0.000000e+00> : vector<512xf32>
    %95 = vector.multi_reduction <add>, %90, %cst_68 [0] : vector<16x512xf32> to vector<512xf32>
    %96 = vector.shape_cast %95 : vector<512xf32> to vector<1x512xf32>
    %97 = arith.mulf %90, %90 : vector<16x512xf32>
    %cst_69 = arith.constant dense<0.000000e+00> : vector<512xf32>
    %98 = vector.multi_reduction <add>, %97, %cst_69 [0] : vector<16x512xf32> to vector<512xf32>
    %99 = vector.shape_cast %98 : vector<512xf32> to vector<1x512xf32>
    %cst_70 = arith.constant dense<0.000000e+00> : vector<1x16xf32>
    %100 = tpu.matmul %96, %93, %cst_70 {dimension_numbers = #tpu.dot_dimension_numbers<[1], [0], [0], [1], [0, 0, 1, 1], [], []>} : vector<1x512xf32>, vector<512x16xf32>, vector<1x16xf32> -> vector<1x16xf32>
    %cst_71 = arith.constant 0.001953125 : f32
    %101 = vector.broadcast %cst_71 : f32 to vector<1x16xf32>
    %102 = arith.mulf %100, %101 : vector<1x16xf32>
    %cst_72 = arith.constant dense<0.000000e+00> : vector<1x16xf32>
    %103 = tpu.matmul %99, %93, %cst_72 {dimension_numbers = #tpu.dot_dimension_numbers<[1], [0], [0], [1], [0, 0, 1, 1], [], []>} : vector<1x512xf32>, vector<512x16xf32>, vector<1x16xf32> -> vector<1x16xf32>
    %cst_73 = arith.constant 0.001953125 : f32
    %104 = vector.broadcast %cst_73 : f32 to vector<1x16xf32>
    %105 = arith.mulf %103, %104 : vector<1x16xf32>
    %106 = arith.mulf %102, %102 : vector<1x16xf32>
    %107 = arith.subf %105, %106 : vector<1x16xf32>
    %cst_74 = arith.constant 0.000000e+00 : f32
    %108 = vector.broadcast %cst_74 : f32 to vector<1x16xf32>
    %109 = arith.maximumf %107, %108 : vector<1x16xf32>
    %cst_75 = arith.constant 9.99999974E-6 : f32
    %110 = vector.broadcast %cst_75 : f32 to vector<1x16xf32>
    %111 = arith.addf %109, %110 : vector<1x16xf32>
    %112 = math.rsqrt %111 : vector<1x16xf32>
    %113 = arith.mulf %91, %112 : vector<1x16xf32>
    %114 = arith.mulf %102, %113 : vector<1x16xf32>
    %115 = arith.subf %92, %114 : vector<1x16xf32>
    %cst_76 = arith.constant dense<0.000000e+00> : vector<1x512xf32>
    %116 = tpu.matmul %113, %94, %cst_76 {dimension_numbers = #tpu.dot_dimension_numbers<[1], [0], [0], [1], [0, 0, 1, 1], [], []>} : vector<1x16xf32>, vector<16x512xf32>, vector<1x512xf32> -> vector<1x512xf32>
    %cst_77 = arith.constant dense<0.000000e+00> : vector<1x512xf32>
    %117 = tpu.matmul %115, %94, %cst_77 {dimension_numbers = #tpu.dot_dimension_numbers<[1], [0], [0], [1], [0, 0, 1, 1], [], []>} : vector<1x16xf32>, vector<16x512xf32>, vector<1x512xf32> -> vector<1x512xf32>
    %118 = vector.broadcast %116 : vector<1x512xf32> to vector<16x512xf32>
    %119 = arith.mulf %90, %118 : vector<16x512xf32>
    %120 = vector.broadcast %117 : vector<1x512xf32> to vector<16x512xf32>
    %121 = arith.addf %119, %120 : vector<16x512xf32>
    %122 = arith.addf %121, %0 : vector<16x512xf32>
    %cst_78 = arith.constant 0.000000e+00 : f32
    %123 = vector.broadcast %cst_78 : f32 to vector<16x512xf32>
    %124 = arith.maximumf %122, %123 : vector<16x512xf32>
    %c0_79 = arith.constant 0 : index
    %c0_80 = arith.constant 0 : index
    %125 = vector.load %arg16[%c0_79, %c0_80] : memref<16x512xf32, #tpu.memory_space<vmem>>, vector<16x512xf32>
    tpu.vector_store %arg16[%c0_79, %c0_80], %124 {strides = array<i32>} : memref<16x512xf32, #tpu.memory_space<vmem>>, vector<16x512xf32>,
    return
  }
}

</mosaic_0001>

<bundles_post_ra>
// kernel: tpu_custom_call.1
= control target key start
LH: loop header
LB: loop body
LE: loop exit
PB: predicated region body
PF: predicated region fallthrough
CT: control target
= control target key end

     0   :  { %s4763_s0 = inlined_call_operand.hbm [shape: f32[16,512], index: 0, kind: input, shape index: {}]   ;;  %s4764_s1 = inlined_call_operand.vmem [shape: bf16[512,128], index: 1, kind: input, shape index: {}]   ;;  %s4765_s2 = inlined_call_operand.vmem [shape: bf16[3,128,128], index: 2, kind: input, shape index: {}]   ;;  %s4766_s3 = inlined_call_operand.vmem [shape: bf16[128,512], index: 3, kind: input, shape index: {}]   ;;  %s4767_s4 = inlined_call_operand.vmem [shape: bf16[16,16], index: 4, kind: input, shape index: {}]   ;;  %s4768_s5 = inlined_call_operand.vmem [shape: bf16[16,16], index: 5, kind: input, shape index: {}]   ;;  %s4769_s6 = inlined_call_operand.vmem [shape: f32[1,4], index: 6, kind: input, shape index: {}]   ;;  %s4770_s7 = inlined_call_operand.vmem [shape: f32[1,4], index: 7, kind: input, shape index: {}]   ;;  %s4771_s8 = inlined_call_operand.vmem [shape: f32[1,4], index: 8, kind: input, shape index: {}]   ;;  %s4772_s9 = inlined_call_operand.vmem [shape: f32[1,4], index: 9, kind: input, shape index: {}]   ;;  %s4773_s10 = inlined_call_operand.vmem [shape: f32[1,16], index: 10, kind: input, shape index: {}]   ;;  %s4774_s11 = inlined_call_operand.vmem [shape: f32[1,16], index: 11, kind: input, shape index: {}]   ;;  %s4775_s12 = inlined_call_operand.vmem [shape: f32[128,4], index: 12, kind: input, shape index: {}]   ;;  %s4776_s13 = inlined_call_operand.vmem [shape: f32[4,128], index: 13, kind: input, shape index: {}]   ;;  %s4777_s14 = inlined_call_operand.vmem [shape: f32[512,16], index: 14, kind: input, shape index: {}]   ;;  %s4778_s15 = inlined_call_operand.hbm [shape: f32[16,512], index: 15, kind: input, shape index: {}]   ;;  %s4779_s16 = inlined_call_operand.hbm [shape: f32[16,512], index: 16, kind: output, shape index: {}]  }
   0x1   :  { %4792 = sst [smem:[#allocation19_spill]] %s4763_s0 }
   0x2   :  { %4793 = sst [smem:[#allocation20_spill]] %s4779_s16 }
   0x3   :  { %21 = vsyncpa [#allocation3], 0 }
   0x4   :  { %22 = vsyncpa [#allocation6], 0 }
   0x5   :  { %23 = vsyncpa [#allocation4], 0  ;;  %s3731_s21 = smov [#allocation2]   ;;  %s4794_s25 = sld [smem:[#allocation19_spill]] }
   0x6   :  { %s29_s22 = sshll.u32 %s3731_s21, 4  ;;  %s30_s22 = int_to_ptr.vmem [resolvable:$true] %s29_s22 }
   0xb   :  { %s3659_s26 = scalar_lea.hbm %s4794_s25, 1024 }
   0xc   :  { %p3660_p0 = scmp.ne.s32.totalorder %s4794_s25, %s3659_s26  ;;  %p3663_p1 = scmp.lt.u32.totalorder %s3659_s26, %s4794_s25 }
   0xe   :  { %p3665_p2 = pnand %p3663_p1, %p3660_p0 }
  0x10   :  { %3668 = shalt.err (!%p3665_p2)
}
  0x11   :  { %s3669_s0 = scalar_lea.vmem %s30_s22, 1024  ;;  %p3674_p4 = scmp.lt.s32.totalorder %s30_s22, %s30_s22 }
  0x12   :  { %p3670_p3 = scmp.ne.s32.totalorder %s30_s22, %s3669_s0  ;;  %p3675_p5 = scmp.lt.s32.totalorder %s3669_s0, %s3669_s0 }
  0x14   :  { %p3676_p6 = por %p3675_p5, %p3674_p4 }
  0x16   :  { %p3677_p7 = pnand %p3676_p6, %p3670_p3 }
  0x18   :  { %3680 = shalt.err (!%p3677_p7)
}
  0x19   :  { %s3732_s17 = smov 512   ;;  %s3733_s18 = smov 32  }
  0x1a   :  { %35 = dma.hbm_to_vmem [thread:$0]  %s4794_s25, 1024, %s30_s22, [#allocation3], %s3732_s17, %s3732_s17, %s3733_s18  }
  0x1b   :  { %s3734_s21 = smov [#allocation5]   ;;  %s3681_s27 = scalar_lea.hbm %s4778_s15, 1024 }
  0x1c   :  { %s69_s23 = sshll.u32 %s3734_s21, 4  ;;  %p3682_p8 = scmp.ne.s32.totalorder %s4778_s15, %s3681_s27  ;;  %s70_s23 = int_to_ptr.vmem [resolvable:$true] %s69_s23 }
  0x1d   :  { %p3685_p9 = scmp.lt.u32.totalorder %s3681_s27, %s4778_s15 }
  0x1f   :  { %p3687_p10 = pnand %p3685_p9, %p3682_p8 }
  0x21   :  { %3690 = shalt.err (!%p3687_p10)
}
  0x22   :  { %s3691_s16 = scalar_lea.vmem %s70_s23, 1024  ;;  %p3696_p12 = scmp.lt.s32.totalorder %s70_s23, %s70_s23 }
  0x23   :  { %p3692_p11 = scmp.ne.s32.totalorder %s70_s23, %s3691_s16  ;;  %p3697_p13 = scmp.lt.s32.totalorder %s3691_s16, %s3691_s16 }
  0x25   :  { %p3698_p0 = por %p3697_p13, %p3696_p12 }
  0x27   :  { %p3699_p1 = pnand %p3698_p0, %p3692_p11 }
  0x29   :  { %3702 = shalt.err (!%p3699_p1)
}
  0x2a   :  { %75 = dma.hbm_to_vmem [thread:$0]  %s4778_s15, 1024, %s70_s23, [#allocation6], %s3732_s17, %s3732_s17, %s3733_s18  }
  0x2b   :  { %3725 = dma.done.wait [#allocation3], 1024  }
  0x2c   :  { %3726 = vsyncadd [#allocation3], 4294966272 }
  0x2d   :  { %3727 = dma.done.wait [#allocation6], 1024  }
  0x2e   :  { %3728 = vsyncadd [#allocation6], 4294966272  ;;  %v3539_v0 = vld [vmem:[%s4764_s1 + $0x40] sm:$0xff]   ;;  %v3543_v4 = vld [vmem:[%s4764_s1 + $0x48] sm:$0xff]   ;;  %v3735_v39 = vmov 0.0|0.0   ;;  %vm3736_vm0 = vmmov 0  }
  0x2f   :  { %v3540_v1 = vld [vmem:[%s4764_s1 + $0xc0] sm:$0xff]   ;;  %2759 = vmatprep.subr.bf16.mxu0 %v3539_v0  ;;  %v3544_v5 = vld [vmem:[%s4764_s1 + $0xc8] sm:$0xff]   ;;  %v3547_v8 = vld [vmem:[%s4764_s1 + $0x50] sm:$0xff]   ;;  %vm622_vm1 = vcmask 1043456   ;;  %vm618_vm2 = vcmask 31744   ;;  %vm791_vm3 = vcmask 130048  }
  0x30   :  { %v3541_v2 = vld [vmem:[%s4764_s1] sm:$0xff]   ;;  %2781 = vmatprep.subr.bf16.mxu1 %v3540_v1  ;;  %v3545_v6 = vld [vmem:[%s4764_s1 + $0x8] sm:$0xff]   ;;  %v3548_v9 = vld [vmem:[%s4764_s1 + $0xd0] sm:$0xff]  }
  0x31   :  { %v3542_v3 = vld [vmem:[%s4764_s1 + $0x80] sm:$0xff]   ;;  %2760 = vmatpush3.bf16.msra.mxu0 %v3541_v2  ;;  %v3546_v7 = vld [vmem:[%s4764_s1 + $0x88] sm:$0xff]   ;;  %v3549_v10 = vld [vmem:[%s4764_s1 + $0x10] sm:$0xff]  }
  0x32   :  { %2782 = vmatpush3.bf16.msra.mxu1 %v3542_v3  ;;  %2761 = vmatprep.subr.bf16.mxu0 %v3543_v4  ;;  %v3550_v11 = vld [vmem:[%s4764_s1 + $0x90] sm:$0xff]   ;;  %v3551_v12 = vld [vmem:[%s4764_s1 + $0x58] sm:$0xff]   ;;  %v3555_v16 = vld [vmem:[%s4764_s1 + $0x60] sm:$0xff]  }
  0x33   :  { %2783 = vmatprep.subr.bf16.mxu1 %v3544_v5  ;;  %v3552_v13 = vld [vmem:[%s4764_s1 + $0xd8] sm:$0xff]   ;;  %v3556_v17 = vld [vmem:[%s4764_s1 + $0xe0] sm:$0xff]   ;;  %v3559_v20 = vld [vmem:[%s4764_s1 + $0x68] sm:$0xff]   ;;  %v4782_v5 = vmov 0.0  }
  0x34   :  { %v3553_v14 = vld [vmem:[%s4764_s1 + $0x18] sm:$0xff]   ;;  %v3557_v18 = vld [vmem:[%s4764_s1 + $0x20] sm:$0xff]   ;;  %v3560_v21 = vld [vmem:[%s4764_s1 + $0xe8] sm:$0xff]  }
  0x35   :  { %2762 = vmatpush3.bf16.msra.mxu0 %v3545_v6  ;;  %v3554_v15 = vld [vmem:[%s4764_s1 + $0x98] sm:$0xff]   ;;  %v3558_v19 = vld [vmem:[%s4764_s1 + $0xa0] sm:$0xff]   ;;  %v3561_v22 = vld [vmem:[%s4764_s1 + $0x28] sm:$0xff]  }
  0x36   :  { %2784 = vmatpush3.bf16.msra.mxu1 %v3546_v7  ;;  %2763 = vmatprep.subr.bf16.mxu0 %v3547_v8  ;;  %v3562_v23 = vld [vmem:[%s4764_s1 + $0xa8] sm:$0xff]   ;;  %v3563_v24 = vld [vmem:[%s4764_s1 + $0x70] sm:$0xff]   ;;  %v3567_v28 = vld [vmem:[%s4764_s1 + $0x78] sm:$0xff]  }
  0x37   :  { %2785 = vmatprep.subr.bf16.mxu1 %v3548_v9  ;;  %v3564_v25 = vld [vmem:[%s4764_s1 + $0xf0] sm:$0xff]   ;;  %v3568_v29 = vld [vmem:[%s4764_s1 + $0xf8] sm:$0xff]   ;;  %v84_v32 = vld [vmem:[#allocation2 + $0x8] sm:$0xff] }
  0x38   :  { %v3565_v26 = vld [vmem:[%s4764_s1 + $0x30] sm:$0xff]   ;;  %v3569_v30 = vld [vmem:[%s4764_s1 + $0x38] sm:$0xff]   ;;  %v88_v33 = vld [vmem:[#allocation2 + $0x28] sm:$0xff] }
  0x39   :  { %2764 = vmatpush3.bf16.msra.mxu0 %v3549_v10  ;;  %v3566_v27 = vld [vmem:[%s4764_s1 + $0xb0] sm:$0xff]   ;;  %v3570_v31 = vld [vmem:[%s4764_s1 + $0xb8] sm:$0xff]   ;;  %v92_v35 = vpack.c.bf16 %v88_v33, %v84_v32  ;;  %v83_v37 = vld [vmem:[#allocation2] sm:$0xff] }
  0x3a   :  { %2786 = vmatpush3.bf16.msra.mxu1 %v3550_v11  ;;  %2765 = vmatprep.subr.bf16.mxu0 %v3551_v12  ;;  %v86_v34 = vld [vmem:[#allocation2 + $0x18] sm:$0xff]  ;;  %v87_v38 = vld [vmem:[#allocation2 + $0x20] sm:$0xff]  ;;  %v85_v42 = vld [vmem:[#allocation2 + $0x10] sm:$0xff] }
  0x3b   :  { %2787 = vmatprep.subr.bf16.mxu1 %v3552_v13  ;;  %v90_v36 = vld [vmem:[#allocation2 + $0x38] sm:$0xff]  ;;  %v91_v41 = vpack.c.bf16 %v87_v38, %v83_v37  ;;  %v89_v43 = vld [vmem:[#allocation2 + $0x30] sm:$0xff]  ;;  %v435_v44 = vld [vmem:[%s4775_s12] sm:$0xff]  ;;  %383 = vmatprep.mubr.bf16.mxu0 %v92_v35 }
  0x3c   :  { %v94_v40 = vpack.c.bf16 %v90_v36, %v86_v34  ;;  %v93_v45 = vpack.c.bf16 %v89_v43, %v85_v42  ;;  %v436_v46 = vld [vmem:[%s4775_s12 + $0x8] sm:$0xff]  ;;  %v437_v47 = vld [vmem:[%s4775_s12 + $0x10] sm:$0xff]  ;;  %v438_v48 = vld [vmem:[%s4775_s12 + $0x18] sm:$0xff] }
  0x3d   :  { %2766 = vmatpush3.bf16.msra.mxu0 %v3553_v14  ;;  %v3965_v49 = vpack.c.bf16 %v436_v46, %v435_v44  ;;  %v439_v50 = vld [vmem:[%s4775_s12 + $0x20] sm:$0xff]  ;;  %v440_v51 = vld [vmem:[%s4775_s12 + $0x28] sm:$0xff]  ;;  %v3975_v52 = vpack.c.bf16 %v438_v48, %v437_v47  ;;  %v441_v54 = vld [vmem:[%s4775_s12 + $0x30] sm:$0xff] }
  0x3e   :  { %2788 = vmatpush3.bf16.msra.mxu1 %v3554_v15  ;;  %2767 = vmatprep.subr.bf16.mxu0 %v3555_v16  ;;  %v3981_v53 = vpack.c.bf16 %v440_v51, %v439_v50  ;;  %v442_v55 = vld [vmem:[%s4775_s12 + $0x38] sm:$0xff]  ;;  %v443_v57 = vld [vmem:[%s4775_s12 + $0x40] sm:$0xff]  ;;  %v444_v58 = vld [vmem:[%s4775_s12 + $0x48] sm:$0xff] }
  0x3f   :  { %2789 = vmatprep.subr.bf16.mxu1 %v3556_v17  ;;  %424 = vmatprep.mubr.bf16.mxu1 %v94_v40  ;;  %v3995_v56 = vpack.c.bf16 %v442_v55, %v441_v54  ;;  %v4007_v59 = vpack.c.bf16 %v444_v58, %v443_v57  ;;  %v445_v60 = vld [vmem:[%s4775_s12 + $0x50] sm:$0xff]  ;;  %v446_v61 = vld [vmem:[%s4775_s12 + $0x58] sm:$0xff]  ;;  %v447_v63 = vld [vmem:[%s4775_s12 + $0x60] sm:$0xff]  ;;  %v769_v58 = vlaneseq }
  0x40   :  { %v4019_v62 = vpack.c.bf16 %v446_v61, %v445_v60  ;;  %v448_v0 = vld [vmem:[%s4775_s12 + $0x68] sm:$0xff]  ;;  %v449_v2 = vld [vmem:[%s4775_s12 + $0x70] sm:$0xff]  ;;  %v450_v3 = vld [vmem:[%s4775_s12 + $0x78] sm:$0xff] }
  0x41   :  { %2768 = vmatpush3.bf16.msra.mxu0 %v3557_v18  ;;  %v4031_v1 = vpack.c.bf16 %v448_v0, %v447_v63  ;;  %v4041_v4 = vpack.c.bf16 %v450_v3, %v449_v2  ;;  %v4060_v36 = vld [vmem:[%s4776_s13] sm:$0xf]  ;;  %v770_v60 = vshrl.u32 %v769_v58, 7 }
  0x42   :  { %2790 = vmatpush3.bf16.msra.mxu1 %v3558_v19  ;;  %2769 = vmatprep.subr.bf16.mxu0 %v3559_v20  ;;  %v433_v48 = vld [vmem:[%s4769_s6] sm:$0x1] }
  0x43   :  { %2791 = vmatprep.subr.bf16.mxu1 %v3560_v21  ;;  %v434_v54 = vld [vmem:[%s4770_s7] sm:$0x1]  ;;  %v4080_v61 = vsub.s32 0, %v770_v60 }
  0x45   :  { %2770 = vmatpush3.bf16.msra.mxu0 %v3561_v22 }
  0x46   :  { %2792 = vmatpush3.bf16.msra.mxu1 %v3562_v23  ;;  %2771 = vmatprep.subr.bf16.mxu0 %v3563_v24 }
  0x47   :  { %2793 = vmatprep.subr.bf16.mxu1 %v3564_v25 }
  0x49   :  { %2772 = vmatpush3.bf16.msra.mxu0 %v3565_v26 }
  0x4a   :  { %2794 = vmatpush3.bf16.msra.mxu1 %v3566_v27  ;;  %2773 = vmatprep.subr.bf16.mxu0 %v3567_v28 }
  0x4b   :  { %2795 = vmatprep.subr.bf16.mxu1 %v3568_v29 }
  0x4d   :  { %2774 = vmatpush3.bf16.msra.mxu0 %v3569_v30 }
  0x4e   :  { %2796 = vmatpush3.bf16.msra.mxu1 %v3570_v31  ;;  %3282 = vmatprep.subr.bf16.mxu0 %v3735_v39 }
  0x4f   :  { %3306 = vmatprep.subr.bf16.mxu1 %v3735_v39 }
  0x50   :  { %384 = vmatmul.mubr.bf16.vlgmr.msra.gmra.mrb[0].mxu0 %v91_v41 }
  0x51   :  { %425 = vmatmul.mubr.bf16.vlgmr.msra.gmra.mrb[0].mxu1 %v93_v45  ;;  %3284 = vmatpush3.bf16.msra.mxu0 %v3965_v49 }
  0x52   :  { %3308 = vmatpush3.bf16.msra.mxu1 %v3965_v49  ;;  %3285 = vmatprep.subr.bf16.mxu0 %v3735_v39 }
  0x53   :  { %3309 = vmatprep.subr.bf16.mxu1 %v3735_v39  ;;  %3082 = vmatprep.mubr.msk.f32.mxu0 %vm3736_vm0, %v4782_v5 }
  0x54   :  { %3117 = vmatprep.mubr.msk.f32.mxu1 %vm3736_vm0, %v4782_v5 }
  0x55   :  { %3287 = vmatpush3.bf16.msra.mxu0 %v3975_v52 }
  0x56   :  { %3311 = vmatpush3.bf16.msra.mxu1 %v3975_v52  ;;  %3288 = vmatprep.subr.bf16.mxu0 %v3735_v39 }
  0x57   :  { %3312 = vmatprep.subr.bf16.mxu1 %v3735_v39 }
  0x59   :  { %3290 = vmatpush3.bf16.msra.mxu0 %v3981_v53 }
  0x5a   :  { %3314 = vmatpush3.bf16.msra.mxu1 %v3981_v53  ;;  %3291 = vmatprep.subr.bf16.mxu0 %v3735_v39 }
  0x5b   :  { %3315 = vmatprep.subr.bf16.mxu1 %v3735_v39 }
  0x5d   :  { %3293 = vmatpush3.bf16.msra.mxu0 %v3995_v56 }
  0x5e   :  { %3317 = vmatpush3.bf16.msra.mxu1 %v3995_v56  ;;  %3294 = vmatprep.subr.bf16.mxu0 %v3735_v39 }
  0x5f   :  { %3318 = vmatprep.subr.bf16.mxu1 %v3735_v39 }
  0x61   :  { %3296 = vmatpush3.bf16.msra.mxu0 %v4007_v59 }
  0x62   :  { %3320 = vmatpush3.bf16.msra.mxu1 %v4007_v59  ;;  %3297 = vmatprep.subr.bf16.mxu0 %v3735_v39 }
  0x63   :  { %3321 = vmatprep.subr.bf16.mxu1 %v3735_v39 }
  0x65   :  { %3299 = vmatpush3.bf16.msra.mxu0 %v4019_v62 }
  0x66   :  { %3323 = vmatpush3.bf16.msra.mxu1 %v4019_v62  ;;  %3300 = vmatprep.subr.bf16.mxu0 %v3735_v39 }
  0x67   :  { %3324 = vmatprep.subr.bf16.mxu1 %v3735_v39 }
  0x69   :  { %3302 = vmatpush3.bf16.msra.mxu0 %v4031_v1 }
  0x6a   :  { %3326 = vmatpush3.bf16.msra.mxu1 %v4031_v1  ;;  %3303 = vmatprep.subr.bf16.mxu0 %v3735_v39 }
  0x6b   :  { %3327 = vmatprep.subr.bf16.mxu1 %v3735_v39 }
  0x6d   :  { %3305 = vmatpush3.bf16.msra.mxu0 %v4041_v4 }
  0x6e   :  { %3329 = vmatpush3.bf16.msra.mxu1 %v4041_v4  ;;  %3130 = vmatprep.subr.bf16.mxu0 %v4782_v5 }
  0x6f   :  { %3120 = vmatprep.subr.mxu1 %v4782_v5 }
 0x123   :  { %v2775_v6 = vpop.f32.mrb[0].mxu0 }
 0x124   :  { %v2797_v7 = vpop.f32.mrb[0].mxu1  ;;  %v2776_v8 = vpop.f32.mrb[1].mxu0 }
 0x125   :  { %v2777_v9 = vadd.f32 %v2776_v8, %v2775_v6  ;;  %v2798_v10 = vpop.f32.mrb[1].mxu1  ;;  %v2778_v11 = vpop.f32.mrb[2].mxu0 }
 0x126   :  { %v2799_v12 = vadd.f32 %v2798_v10, %v2797_v7  ;;  %v2800_v13 = vpop.f32.mrb[2].mxu1  ;;  %v2779_v14 = vpop.f32.mrb[3].mxu0 }
 0x127   :  { %v2780_v15 = vadd.f32 %v2779_v14, %v2778_v11  ;;  %v2801_v16 = vpop.f32.mrb[3].mxu1 }
 0x128   :  { %v427_v17 = vadd.f32 %v2799_v12, %v2777_v9  ;;  %v2802_v18 = vadd.f32 %v2801_v16, %v2800_v13  ;;  %v3579_v16 = vld [vmem:[%s4768_s5] sm:$0xff]  }
 0x12a   :  { %v430_v19 = vadd.f32 %v2802_v18, %v2780_v15  ;;  %v459_v20 = vmul.f32 %v427_v17, %v427_v17  ;;  %v3571_v15 = vld [vmem:[%s4767_s4] sm:$0xff]   ;;  %v3573_v18 = vld [vmem:[%s4765_s2 + $0x48] sm:$0xff]  }
 0x12c   :  { %v452_v21 = vadd.f32 %v430_v19, %v427_v17  ;;  %v460_v22 = vmul.f32 %v430_v19, %v430_v19 }
 0x12e   :  { %v453_v23 = vrot.slane %v452_v21, 4  ;;  %v461_v24 = vadd.f32 %v460_v22, %v459_v20  ;;  %v3575_v20 = vld [vmem:[%s4765_s2 + $0x58] sm:$0xff]   ;;  %v3577_v22 = vld [vmem:[%s4765_s2 + $0x68] sm:$0xff]  }
 0x130   :  { %v454_v25 = vadd.f32 %v453_v23, %v452_v21  ;;  %v462_v26 = vrot.slane %v461_v24, 4  ;;  %v3576_v21 = vld [vmem:[%s4765_s2 + $0x60] sm:$0xff]   ;;  %v3578_v23 = vld [vmem:[%s4765_s2 + $0x70] sm:$0xff]  }
 0x132   :  { %v455_v27 = vrot.slane %v454_v25, 2  ;;  %v463_v28 = vadd.f32 %v462_v26, %v461_v24  ;;  %v3580_v24 = vld [vmem:[%s4765_s2 + $0x78] sm:$0xff]   ;;  %v3582_v26 = vld [vmem:[%s4765_s2 + $0x8] sm:$0xff]  }
 0x134   :  { %v456_v29 = vadd.f32 %v455_v27, %v454_v25  ;;  %v464_v30 = vrot.slane %v463_v28, 2  ;;  %v3581_v25 = vld [vmem:[%s4765_s2] sm:$0xff]   ;;  %v3583_v27 = vld [vmem:[%s4765_s2 + $0x10] sm:$0xff]  }
 0x136   :  { %v457_v31 = vrot.slane %v456_v29, 1  ;;  %v465_v32 = vadd.f32 %v464_v30, %v463_v28  ;;  %v3584_v28 = vld [vmem:[%s4765_s2 + $0x18] sm:$0xff]   ;;  %v3586_v30 = vld [vmem:[%s4765_s2 + $0x28] sm:$0xff]  }
 0x138   :  { %v458_v33 = vadd.f32 %v457_v31, %v456_v29  ;;  %v466_v34 = vrot.slane %v465_v32, 1  ;;  %v3585_v29 = vld [vmem:[%s4765_s2 + $0x20] sm:$0xff]   ;;  %v3587_v31 = vld [vmem:[%s4765_s2 + $0x30] sm:$0xff]  }
 0x13a   :  { %3083 = vmatmul.mubr.f32.vlgmr.msra.gmra.mrb[4].mxu0 %v458_v33  ;;  %v467_v35 = vadd.f32 %v466_v34, %v465_v32  ;;  %v3588_v32 = vld [vmem:[%s4765_s2 + $0x38] sm:$0xff]  }
 0x13b   :  { %3132 = vmatprep.mubr.msk.bf16.mxu0 %vm3736_vm0, %v4782_v5 }
 0x13c   :  { %3118 = vmatmul.mubr.f32.vlgmr.msra.gmra.mrb[4].mxu1 %v467_v35 }
 0x13d   :  { %3122 = vmatprep.mubr.msk.f32.mxu1 %vm3736_vm0, %v4782_v5  ;;  %3121 = vmatpush3.msk.msra.mxu1 %vm622_vm1, %v4060_v36 }
 0x13e   :  { %3125 = vmatprep.subr.mxu1 %v4782_v5 }
 0x20d   :  { %v534_v37 = vpop.f32.mrb[4].mxu0 }
 0x20e   :  { %v538_v38 = vmul.f32 0.001953125, %v534_v37  ;;  %v3084_v40 = vpop.f32.mrb[5].mxu0 }
 0x20f   :  { %v605_v41 = vpop.f32.mrb[4].mxu1  ;;  %v3589_v40 = vld [vmem:[%s4765_s2 + $0x80] sm:$0xff]  }
 0x210   :  { %v610_v42 = vmul.f32 %v538_v38, %v538_v38  ;;  %v609_v43 = vmul.f32 0.001953125, %v605_v41  ;;  %v3119_v44 = vpop.f32.mrb[5].mxu1 }
 0x212   :  { %v611_v45 = vsub.f32 %v609_v43, %v610_v42 }
 0x214   :  { %v612_v46 = vmax.f32 %v611_v45, 0.0 }
 0x216   :  { %v613_v47 = vadd.f32 1e-05, %v612_v46  ;;  %v3590_v46 = vld [vmem:[%s4765_s2 + $0x88] sm:$0xff]  }
 0x218   :  { %3645 = vrsqrt.f32 %v613_v47  ;;  %v3591_v47 = vld [vmem:[%s4765_s2 + $0x90] sm:$0xff]  }
 0x222   :  { %v3646_v50 = vpop.eup %3645 }
 0x223   :  { %v615_v51 = vmul.f32 %v3646_v50, %v433_v48  ;;  %v3592_v48 = vld [vmem:[%s4765_s2 + $0x98] sm:$0xff]   ;;  %v3593_v50 = vld [vmem:[%s4765_s2 + $0xa0] sm:$0xff]  }
 0x225   :  { %3123 = vmatmul.mubr.msk.f32.vlgmr.msra.gmra.mrb[6].mxu1 %vm618_vm2, %v615_v51  ;;  %v616_v55 = vmul.f32 %v615_v51, %v538_v38  ;;  %v3594_v51 = vld [vmem:[%s4765_s2 + $0xa8] sm:$0xff]  }
 0x226   :  { %3126 = vmatpush3.msk.msra.mxu1 %vm622_vm1, %v4060_v36  ;;  %3127 = vmatprep.mubr.msk.f32.mxu1 %vm3736_vm0, %v4782_v5 }
 0x227   :  { %v617_v57 = vsub.f32 %v434_v54, %v616_v55  ;;  %3136 = vmatprep.subr.bf16.mxu1 %v4782_v5  ;;  %v3595_v54 = vld [vmem:[%s4765_s2 + $0xb0] sm:$0xff]   ;;  %v3596_v55 = vld [vmem:[%s4765_s2 + $0xb8] sm:$0xff]  }
 0x229   :  { %3128 = vmatmul.mubr.msk.f32.vlgmr.msra.gmra.mrb[8].mxu1 %vm618_vm2, %v617_v57 }
 0x22a   :  { %3138 = vmatprep.mubr.msk.bf16.mxu1 %vm3736_vm0, %v4782_v5 }
 0x2f8   :  { %v692_v63 = vpop.f32.mrb[6].mxu1 }
 0x2f9   :  { %v772_v0 = vrot.slane %v692_v63, %v4080_v61  ;;  %v3124_v2 = vpop.f32.mrb[7].mxu1 }
 0x2fb   :  { %v773_v6 = vmul.f32 %v772_v0, %v427_v17  ;;  %v774_v7 = vmul.f32 %v772_v0, %v430_v19  ;;  %v3572_v17 = vld [vmem:[%s4765_s2 + $0x40] sm:$0xff]   ;;  %v3574_v19 = vld [vmem:[%s4765_s2 + $0x50] sm:$0xff]  }
 0x2fc   :  { %v765_v3 = vpop.f32.mrb[8].mxu1 }
 0x2fd   :  { %v778_v8 = vrot.slane %v765_v3, %v4080_v61  ;;  %v3129_v9 = vpop.f32.mrb[9].mxu1 }
 0x2ff   :  { %v779_v10 = vadd.f32 %v778_v8, %v773_v6  ;;  %v780_v11 = vadd.f32 %v778_v8, %v774_v7 }
 0x301   :  { %v781_v12 = vmax.f32 %v779_v10, 0.0  ;;  %v782_v13 = vmax.f32 %v780_v11, 0.0 }
 0x303   :  { %v783_v14 = vpack.c.bf16 %v782_v13, %v781_v12 }
 0x305   :  { %3131 = vmatpush3.bf16.msra.mxu0 %v783_v14  ;;  %3137 = vmatpush3.bf16.msra.mxu1 %v783_v14 }
 0x306   :  { %3142 = vmatprep.subr.bf16.mxu0 %v4782_v5  ;;  %3330 = vmatprep.subr.bf16.mxu1 %v3735_v39 }
 0x308   :  { %3133 = vmatmul.mubr.msk.bf16.vlgmr.msra.gmra.mrb[8].mxu0 %vm791_vm3, %v3571_v15  ;;  %3139 = vmatmul.mubr.msk.bf16.vlgmr.msra.gmra.mrb[12].mxu1 %vm791_vm3, %v3579_v16  ;;  %v3612_v15 = vld [vmem:[%s4766_s3 + $0x48] ss:$16 sps:$4 sm:$0xff]   ;;  %v3620_v16 = vld [vmem:[%s4766_s3 + $0x6c] ss:$16 sps:$4 sm:$0xff]  }
 0x309   :  { %3143 = vmatpush3.bf16.msra.mxu0 %v3572_v17  ;;  %3158 = vmatprep.mubr.msk.bf16.mxu0 %vm3736_vm0, %v4782_v5  ;;  %v3618_v17 = vld [vmem:[%s4766_s3 + $0x68] ss:$16 sps:$4 sm:$0xff]  }
 0x30a   :  { %3144 = vmatprep.subr.bf16.mxu0 %v4782_v5  ;;  %3332 = vmatpush3.bf16.msra.mxu1 %v3965_v49 }
 0x30b   :  { %3333 = vmatprep.subr.bf16.mxu1 %v3735_v39  ;;  %3234 = vmatprep.mubr.msk.f32.mxu1 %vm3736_vm0, %v4782_v5 }
 0x30d   :  { %3145 = vmatpush3.bf16.msra.mxu0 %v3573_v18  ;;  %v3626_v18 = vld [vmem:[%s4766_s3 + $0x8c] ss:$16 sps:$4 sm:$0xff]  }
 0x30e   :  { %3146 = vmatprep.subr.bf16.mxu0 %v4782_v5  ;;  %3335 = vmatpush3.bf16.msra.mxu1 %v3975_v52 }
 0x30f   :  { %3336 = vmatprep.subr.bf16.mxu1 %v3735_v39 }
 0x311   :  { %3147 = vmatpush3.bf16.msra.mxu0 %v3574_v19  ;;  %v3624_v19 = vld [vmem:[%s4766_s3 + $0x88] ss:$16 sps:$4 sm:$0xff]  }
 0x312   :  { %3148 = vmatprep.subr.bf16.mxu0 %v4782_v5  ;;  %3338 = vmatpush3.bf16.msra.mxu1 %v3981_v53 }
 0x313   :  { %3339 = vmatprep.subr.bf16.mxu1 %v3735_v39 }
 0x315   :  { %3149 = vmatpush3.bf16.msra.mxu0 %v3575_v20 }
 0x316   :  { %3150 = vmatprep.subr.bf16.mxu0 %v4782_v5  ;;  %3341 = vmatpush3.bf16.msra.mxu1 %v3995_v56 }
 0x317   :  { %3342 = vmatprep.subr.bf16.mxu1 %v3735_v39 }
 0x319   :  { %3151 = vmatpush3.bf16.msra.mxu0 %v3576_v21 }
 0x31a   :  { %3152 = vmatprep.subr.bf16.mxu0 %v4782_v5  ;;  %3344 = vmatpush3.bf16.msra.mxu1 %v4007_v59 }
 0x31b   :  { %3345 = vmatprep.subr.bf16.mxu1 %v3735_v39 }
 0x31d   :  { %3153 = vmatpush3.bf16.msra.mxu0 %v3577_v22 }
 0x31e   :  { %3154 = vmatprep.subr.bf16.mxu0 %v4782_v5  ;;  %3347 = vmatpush3.bf16.msra.mxu1 %v4019_v62 }
 0x31f   :  { %3348 = vmatprep.subr.bf16.mxu1 %v3735_v39 }
 0x321   :  { %3155 = vmatpush3.bf16.msra.mxu0 %v3578_v23 }
 0x322   :  { %3156 = vmatprep.subr.bf16.mxu0 %v4782_v5  ;;  %3350 = vmatpush3.bf16.msra.mxu1 %v4031_v1 }
 0x323   :  { %3351 = vmatprep.subr.bf16.mxu1 %v3735_v39 }
 0x325   :  { %3157 = vmatpush3.bf16.msra.mxu0 %v3580_v24 }
 0x326   :  { %3162 = vmatprep.subr.bf16.mxu0 %v4782_v5  ;;  %3353 = vmatpush3.bf16.msra.mxu1 %v4041_v4 }
 0x327   :  { %3354 = vmatprep.subr.bf16.mxu1 %v3735_v39 }
 0x328   :  { %3159 = vmatmul.mubr.bf16.vlgmr.msra.gmra.mrb[12].mxu0 %v783_v14 }
 0x329   :  { %3163 = vmatpush3.bf16.msra.mxu0 %v3581_v25  ;;  %3178 = vmatprep.mubr.msk.bf16.mxu0 %vm3736_vm0, %v4782_v5 }
 0x32a   :  { %3164 = vmatprep.subr.bf16.mxu0 %v4782_v5 }
 0x32d   :  { %3165 = vmatpush3.bf16.msra.mxu0 %v3582_v26 }
 0x32e   :  { %3166 = vmatprep.subr.bf16.mxu0 %v4782_v5 }
 0x331   :  { %3167 = vmatpush3.bf16.msra.mxu0 %v3583_v27 }
 0x332   :  { %3168 = vmatprep.subr.bf16.mxu0 %v4782_v5 }
 0x335   :  { %3169 = vmatpush3.bf16.msra.mxu0 %v3584_v28 }
 0x336   :  { %3170 = vmatprep.subr.bf16.mxu0 %v4782_v5 }
 0x339   :  { %3171 = vmatpush3.bf16.msra.mxu0 %v3585_v29 }
 0x33a   :  { %3172 = vmatprep.subr.bf16.mxu0 %v4782_v5 }
 0x33d   :  { %3173 = vmatpush3.bf16.msra.mxu0 %v3586_v30  ;;  %v1208_v30 = vld [vmem:[%s4771_s8] sm:$0x1] }
 0x33e   :  { %3174 = vmatprep.subr.bf16.mxu0 %v4782_v5 }
 0x341   :  { %3175 = vmatpush3.bf16.msra.mxu0 %v3587_v31 }
 0x342   :  { %3176 = vmatprep.subr.bf16.mxu0 %v4782_v5 }
 0x345   :  { %3177 = vmatpush3.bf16.msra.mxu0 %v3588_v32 }
 0x346   :  { %3182 = vmatprep.subr.bf16.mxu0 %v4782_v5 }
 0x3db   :  { %v829_v33 = vpop.f32.mrb[8].mxu0  ;;  %v881_v34 = vpop.f32.mrb[12].mxu1 }
 0x3dc   :  { %v3134_v35 = vpop.f32.mrb[9].mxu0  ;;  %v3140_v37 = vpop.f32.mrb[13].mxu1 }
 0x3dd   :  { %v832_v38 = vpop.f32.mrb[10].mxu0  ;;  %v884_v41 = vpop.f32.mrb[14].mxu1  ;;  %v3597_v37 = vld [vmem:[%s4766_s3] ss:$16 sps:$4 sm:$0xff]  }
 0x3de   :  { %v836_v42 = vpack.c.bf16 %v832_v38, %v829_v33  ;;  %v3135_v43 = vpop.f32.mrb[11].mxu0  ;;  %v888_v44 = vpack.c.bf16 %v884_v41, %v881_v34  ;;  %v3141_v45 = vpop.f32.mrb[15].mxu1  ;;  %v3599_v33 = vld [vmem:[%s4766_s3 + $0x4] ss:$16 sps:$4 sm:$0xff]   ;;  %v1209_v34 = vld [vmem:[%s4772_s9] sm:$0x1] }
 0x3df   :  { %v3611_v41 = vld [vmem:[%s4766_s3 + $0x44] ss:$16 sps:$4 sm:$0xff]  }
 0x3e0   :  { %3179 = vmatmul.mubr.bf16.vlgmr.msra.gmra.mrb[12].mxu0 %v836_v42  ;;  %v3609_v42 = vld [vmem:[%s4766_s3 + $0x40] ss:$16 sps:$4 sm:$0xff]   ;;  %v3617_v43 = vld [vmem:[%s4766_s3 + $0x64] ss:$16 sps:$4 sm:$0xff]  }
 0x3e1   :  { %3183 = vmatpush3.bf16.msra.mxu0 %v3589_v40  ;;  %3198 = vmatprep.mubr.msk.bf16.mxu0 %vm3736_vm0, %v4782_v5  ;;  %v3605_v40 = vld [vmem:[%s4766_s3 + $0x24] ss:$16 sps:$4 sm:$0xff]  }
 0x3e2   :  { %3184 = vmatprep.subr.bf16.mxu0 %v4782_v5  ;;  %v3623_v45 = vld [vmem:[%s4766_s3 + $0x84] ss:$16 sps:$4 sm:$0xff]  }
 0x3e5   :  { %3185 = vmatpush3.bf16.msra.mxu0 %v3590_v46  ;;  %v3621_v46 = vld [vmem:[%s4766_s3 + $0x80] ss:$16 sps:$4 sm:$0xff]  }
 0x3e6   :  { %3186 = vmatprep.subr.bf16.mxu0 %v4782_v5 }
 0x3e9   :  { %3187 = vmatpush3.bf16.msra.mxu0 %v3591_v47  ;;  %v3629_v47 = vld [vmem:[%s4766_s3 + $0xa4] ss:$16 sps:$4 sm:$0xff]  }
 0x3ea   :  { %3188 = vmatprep.subr.bf16.mxu0 %v4782_v5 }
 0x3ed   :  { %3189 = vmatpush3.bf16.msra.mxu0 %v3592_v48  ;;  %v3632_v48 = vld [vmem:[%s4766_s3 + $0xac] ss:$16 sps:$4 sm:$0xff]  }
 0x3ee   :  { %3190 = vmatprep.subr.bf16.mxu0 %v4782_v5 }
 0x3f1   :  { %3191 = vmatpush3.bf16.msra.mxu0 %v3593_v50  ;;  %v3627_v50 = vld [vmem:[%s4766_s3 + $0xa0] ss:$16 sps:$4 sm:$0xff]  }
 0x3f2   :  { %3192 = vmatprep.subr.bf16.mxu0 %v4782_v5 }
 0x3f5   :  { %3193 = vmatpush3.bf16.msra.mxu0 %v3594_v51  ;;  %v3630_v51 = vld [vmem:[%s4766_s3 + $0xa8] ss:$16 sps:$4 sm:$0xff]  }
 0x3f6   :  { %3194 = vmatprep.subr.bf16.mxu0 %v4782_v5 }
 0x3f9   :  { %3195 = vmatpush3.bf16.msra.mxu0 %v3595_v54  ;;  %v3635_v54 = vld [vmem:[%s4766_s3 + $0xc4] ss:$16 sps:$4 sm:$0xff]  }
 0x3fa   :  { %3196 = vmatprep.subr.bf16.mxu0 %v4782_v5 }
 0x3fd   :  { %3197 = vmatpush3.bf16.msra.mxu0 %v3596_v55  ;;  %v3638_v55 = vld [vmem:[%s4766_s3 + $0xcc] ss:$16 sps:$4 sm:$0xff]  }
 0x400   :  { %3199 = vmatmul.mubr.bf16.vlgmr.msra.gmra.mrb[12].mxu0 %v888_v44  ;;  %v3615_v44 = vld [vmem:[%s4766_s3 + $0x60] ss:$16 sps:$4 sm:$0xff]  }
 0x4d3   :  { %v4213_v57 = vpop.f32.mrb[12].mxu0 }
 0x4d4   :  { %v3200_v58 = vpop.f32.mrb[13].mxu0  ;;  %v1217_v63 = vmul.f32 %v4213_v57, %v4213_v57 }
 0x4d5   :  { %v4215_v60 = vpop.f32.mrb[14].mxu0  ;;  %v3633_v58 = vld [vmem:[%s4766_s3 + $0xc0] ss:$16 sps:$4 sm:$0xff]  }
 0x4d6   :  { %v1210_v0 = vadd.f32 %v4215_v60, %v4213_v57  ;;  %v1218_v2 = vmul.f32 %v4215_v60, %v4215_v60  ;;  %v3201_v3 = vpop.f32.mrb[15].mxu0 }
 0x4d7   :  { %v3639_v3 = vld [vmem:[%s4766_s3 + $0xe0] ss:$16 sps:$4 sm:$0xff]  }
 0x4d8   :  { %v1211_v6 = vrot.slane %v1210_v0, 4  ;;  %v1219_v7 = vadd.f32 %v1218_v2, %v1217_v63  ;;  %v3636_v63 = vld [vmem:[%s4766_s3 + $0xc8] ss:$16 sps:$4 sm:$0xff]   ;;  %v3644_v2 = vld [vmem:[%s4766_s3 + $0xec] ss:$16 sps:$4 sm:$0xff]  }
 0x4da   :  { %v1212_v8 = vadd.f32 %v1211_v6, %v1210_v0  ;;  %v1220_v13 = vrot.slane %v1219_v7, 4  ;;  %v3641_v0 = vld [vmem:[%s4766_s3 + $0xe4] ss:$16 sps:$4 sm:$0xff]   ;;  %v3642_v6 = vld [vmem:[%s4766_s3 + $0xe8] ss:$16 sps:$4 sm:$0xff]  }
 0x4dc   :  { %v1213_v9 = vrot.slane %v1212_v8, 2  ;;  %v1221_v14 = vadd.f32 %v1220_v13, %v1219_v7  ;;  %v3738_v7 = vmov 0  }
 0x4dd   :  { %1804 = vmatprep.mubr.bf16.mxu0 %v3738_v7 }
 0x4de   :  { %v1214_v10 = vadd.f32 %v1213_v9, %v1212_v8  ;;  %v1833_v8 = vld [vmem:[%s4777_s14 + $0x80] sm:$0xff]  ;;  %v1834_v9 = vld [vmem:[%s4777_s14 + $0x88] sm:$0xff] }
 0x4e0   :  { %v1215_v11 = vrot.slane %v1214_v10, 1 }
 0x4e2   :  { %v1216_v12 = vadd.f32 %v1215_v11, %v1214_v10  ;;  %v1865_v10 = vld [vmem:[%s4777_s14 + $0x180] sm:$0xff]  ;;  %v4363_v11 = vpack.c.bf16 %v1834_v9, %v1833_v8  ;;  %v1842_v8 = vld [vmem:[%s4777_s14 + $0xc8] sm:$0xff] }
 0x4e3   :  { %v1873_v9 = vld [vmem:[%s4777_s14 + $0x1c0] sm:$0xff] }
 0x4e4   :  { %3235 = vmatmul.mubr.f32.vlgmr.msra.gmra.mrb[10].mxu1 %v1216_v12  ;;  %v1866_v12 = vld [vmem:[%s4777_s14 + $0x188] sm:$0xff] }
 0x4e5   :  { %3356 = vmatpush3.bf16.msra.mxu1 %v3965_v49  ;;  %3269 = vmatprep.mubr.msk.f32.mxu1 %vm3736_vm0, %v4782_v5  ;;  %v1222_v49 = vrot.slane %v1221_v14, 2  ;;  %v4368_v13 = vpack.c.bf16 %v1866_v12, %v1865_v10  ;;  %v1874_v12 = vld [vmem:[%s4777_s14 + $0x1c8] sm:$0xff] }
 0x4e6   :  { %3357 = vmatprep.subr.bf16.mxu1 %v3735_v39 }
 0x4e9   :  { %3359 = vmatpush3.bf16.msra.mxu1 %v3975_v52  ;;  %v1223_v52 = vadd.f32 %v1222_v49, %v1221_v14 }
 0x4ea   :  { %3360 = vmatprep.subr.bf16.mxu1 %v3735_v39 }
 0x4ed   :  { %3362 = vmatpush3.bf16.msra.mxu1 %v3981_v53  ;;  %v1224_v53 = vrot.slane %v1223_v52, 1 }
 0x4ee   :  { %3363 = vmatprep.subr.bf16.mxu1 %v3735_v39 }
 0x4f1   :  { %3365 = vmatpush3.bf16.msra.mxu1 %v3995_v56  ;;  %v1225_v56 = vadd.f32 %v1224_v53, %v1223_v52 }
 0x4f2   :  { %3366 = vmatprep.subr.bf16.mxu1 %v3735_v39 }
 0x4f5   :  { %3368 = vmatpush3.bf16.msra.mxu1 %v4007_v59  ;;  %v3600_v59 = vld [vmem:[%s4766_s3 + $0x8] ss:$16 sps:$4 sm:$0xff]  }
 0x4f6   :  { %3369 = vmatprep.subr.bf16.mxu1 %v3735_v39 }
 0x4f9   :  { %3371 = vmatpush3.bf16.msra.mxu1 %v4019_v62  ;;  %v3608_v62 = vld [vmem:[%s4766_s3 + $0x2c] ss:$16 sps:$4 sm:$0xff]  }
 0x4fa   :  { %3372 = vmatprep.subr.bf16.mxu1 %v3735_v39 }
 0x4fd   :  { %3374 = vmatpush3.bf16.msra.mxu1 %v4031_v1  ;;  %v3606_v1 = vld [vmem:[%s4766_s3 + $0x28] ss:$16 sps:$4 sm:$0xff]  }
 0x4fe   :  { %3375 = vmatprep.subr.bf16.mxu1 %v3735_v39  ;;  %v3602_v39 = vld [vmem:[%s4766_s3 + $0xc] ss:$16 sps:$4 sm:$0xff]  }
 0x4ff   :  { %1772 = vmatprep.subr.bf16.mxu0 %v3602_v39 }
 0x500   :  { %1773 = vmatpush1.bf16.msra.mxu0 %v3600_v59 }
 0x501   :  { %3377 = vmatpush3.bf16.msra.mxu1 %v4041_v4  ;;  %1774 = vmatprep.subr.bf16.mxu0 %v3608_v62  ;;  %v3614_v4 = vld [vmem:[%s4766_s3 + $0x4c] ss:$16 sps:$4 sm:$0xff]  }
 0x502   :  { %3272 = vmatprep.subr.mxu1 %v4782_v5 }
 0x504   :  { %3270 = vmatmul.mubr.f32.vlgmr.msra.gmra.mrb[16].mxu1 %v1225_v56  ;;  %1775 = vmatpush1.bf16.msra.mxu0 %v3606_v1  ;;  %v1817_v1 = vld [vmem:[%s4777_s14] sm:$0xff] }
 0x505   :  { %3273 = vmatpush3.msk.msra.mxu1 %vm622_vm1, %v4060_v36  ;;  %3274 = vmatprep.mubr.msk.f32.mxu1 %vm3736_vm0, %v4782_v5 }
 0x506   :  { %3277 = vmatprep.subr.mxu1 %v4782_v5  ;;  %1776 = vmatprep.subr.bf16.mxu0 %v3614_v4  ;;  %v1818_v4 = vld [vmem:[%s4777_s14 + $0x8] sm:$0xff] }
 0x508   :  { %1777 = vmatpush1.bf16.msra.mxu0 %v3612_v15 }
 0x509   :  { %1778 = vmatprep.subr.bf16.mxu0 %v3620_v16 }
 0x50c   :  { %1779 = vmatpush1.bf16.msra.mxu0 %v3618_v17  ;;  %v1835_v17 = vld [vmem:[%s4777_s14 + $0x90] sm:$0xff] }
 0x50d   :  { %1780 = vmatprep.subr.bf16.mxu0 %v3626_v18  ;;  %v1836_v18 = vld [vmem:[%s4777_s14 + $0x98] sm:$0xff] }
 0x510   :  { %1781 = vmatpush1.bf16.msra.mxu0 %v3624_v19  ;;  %v1867_v19 = vld [vmem:[%s4777_s14 + $0x190] sm:$0xff] }
 0x511   :  { %1782 = vmatprep.subr.bf16.mxu0 %v3632_v48  ;;  %v1872_v48 = vld [vmem:[%s4777_s14 + $0x1b8] sm:$0xff] }
 0x514   :  { %1783 = vmatpush1.bf16.msra.mxu0 %v3630_v51 }
 0x515   :  { %1784 = vmatprep.subr.bf16.mxu0 %v3638_v55 }
 0x518   :  { %1785 = vmatpush1.bf16.msra.mxu0 %v3636_v63  ;;  %v1824_v63 = vld [vmem:[%s4777_s14 + $0x38] sm:$0xff] }
 0x519   :  { %1786 = vmatprep.subr.bf16.mxu0 %v3644_v2  ;;  %v1856_v2 = vld [vmem:[%s4777_s14 + $0x138] sm:$0xff] }
 0x51c   :  { %1787 = vmatpush1.bf16.msra.mxu0 %v3642_v6 }
 0x51d   :  { %3411 = vmatprep.subr.bf16.mxu0 %v4368_v13 }
 0x5b7   :  { %v1292_v20 = vpop.f32.mrb[10].mxu1 }
 0x5b8   :  { %v3236_v21 = vpop.f32.mrb[11].mxu1  ;;  %v1296_v22 = vmul.f32 0.001953125, %v1292_v20  ;;  %v1868_v20 = vld [vmem:[%s4777_s14 + $0x198] sm:$0xff] }
 0x5ba   :  { %v1368_v24 = vmul.f32 %v1296_v22, %v1296_v22 }
 0x5d7   :  { %v1363_v23 = vpop.f32.mrb[16].mxu1 }
 0x5d8   :  { %v1367_v25 = vmul.f32 0.001953125, %v1363_v23  ;;  %v3271_v26 = vpop.f32.mrb[17].mxu1  ;;  %v4400_v23 = vpack.c.bf16 %v1818_v4, %v1817_v1  ;;  %v1844_v1 = vld [vmem:[%s4777_s14 + $0xd8] sm:$0xff]  ;;  %v1875_v4 = vld [vmem:[%s4777_s14 + $0x1d0] sm:$0xff] }
 0x5d9   :  { %v1820_v26 = vld [vmem:[%s4777_s14 + $0x18] sm:$0xff] }
 0x5da   :  { %v1369_v27 = vsub.f32 %v1367_v25, %v1368_v24  ;;  %v1819_v25 = vld [vmem:[%s4777_s14 + $0x10] sm:$0xff] }
 0x5dc   :  { %v1370_v28 = vmax.f32 %v1369_v27, 0.0 }
 0x5de   :  { %v1371_v29 = vadd.f32 1e-05, %v1370_v28  ;;  %v4410_v28 = vpack.c.bf16 %v1836_v18, %v1835_v17 }
 0x5e0   :  { %3647 = vrsqrt.f32 %v1371_v29  ;;  %v4412_v29 = vpack.c.bf16 %v1868_v20, %v1867_v19  ;;  %v1859_v19 = vld [vmem:[%s4777_s14 + $0x150] sm:$0xff]  ;;  %v1860_v20 = vld [vmem:[%s4777_s14 + $0x158] sm:$0xff] }
 0x5ea   :  { %v3648_v31 = vpop.eup %3647 }
 0x5eb   :  { %v1373_v32 = vmul.f32 %v3648_v31, %v1208_v30  ;;  %v1851_v30 = vld [vmem:[%s4777_s14 + $0x110] sm:$0xff]  ;;  %v1852_v31 = vld [vmem:[%s4777_s14 + $0x118] sm:$0xff] }
 0x5ed   :  { %3275 = vmatmul.mubr.msk.f32.vlgmr.msra.gmra.mrb[18].mxu1 %vm618_vm2, %v1373_v32  ;;  %v1374_v35 = vmul.f32 %v1373_v32, %v1296_v22  ;;  %v1837_v32 = vld [vmem:[%s4777_s14 + $0xa0] sm:$0xff] }
 0x5ee   :  { %3278 = vmatpush3.msk.msra.mxu1 %vm622_vm1, %v4060_v36  ;;  %3279 = vmatprep.mubr.msk.f32.mxu1 %vm3736_vm0, %v4782_v5  ;;  %v3603_v36 = vld [vmem:[%s4766_s3 + $0x20] ss:$16 sps:$4 sm:$0xff]  }
 0x5ef   :  { %v1375_v38 = vsub.f32 %v1209_v34, %v1374_v35  ;;  %1729 = vmatprep.subr.bf16.mxu1 %v3599_v33  ;;  %v1838_v33 = vld [vmem:[%s4777_s14 + $0xa8] sm:$0xff]  ;;  %v1869_v34 = vld [vmem:[%s4777_s14 + $0x1a0] sm:$0xff] }
 0x5f0   :  { %v1870_v35 = vld [vmem:[%s4777_s14 + $0x1a8] sm:$0xff] }
 0x5f1   :  { %3280 = vmatmul.mubr.msk.f32.vlgmr.msra.gmra.mrb[20].mxu1 %vm618_vm2, %v1375_v38  ;;  %v4436_v38 = vpack.c.bf16 %v1852_v31, %v1851_v30  ;;  %v1878_v30 = vld [vmem:[%s4777_s14 + $0x1e8] sm:$0xff]  ;;  %v1829_v31 = vld [vmem:[%s4777_s14 + $0x60] sm:$0xff] }
 0x5f2   :  { %1730 = vmatpush1.bf16.msra.mxu1 %v3597_v37  ;;  %1761 = vmatprep.mubr.bf16.mxu1 %v3738_v7  ;;  %v4434_v37 = vpack.c.bf16 %v1820_v26, %v1819_v25  ;;  %v1841_v7 = vld [vmem:[%s4777_s14 + $0xc0] sm:$0xff]  ;;  %v1846_v25 = vld [vmem:[%s4777_s14 + $0xe8] sm:$0xff] }
 0x5f3   :  { %1731 = vmatprep.subr.bf16.mxu1 %v3605_v40  ;;  %v1821_v40 = vld [vmem:[%s4777_s14 + $0x20] sm:$0xff]  ;;  %v4511_v10 = vpack.c.bf16 %v1842_v8, %v1841_v7  ;;  %v1864_v7 = vld [vmem:[%s4777_s14 + $0x178] sm:$0xff] }
 0x5f4   :  { %v1877_v26 = vld [vmem:[%s4777_s14 + $0x1e0] sm:$0xff] }
 0x5f6   :  { %1732 = vmatpush1.bf16.msra.mxu1 %v3603_v36  ;;  %v1822_v36 = vld [vmem:[%s4777_s14 + $0x28] sm:$0xff] }
 0x5f7   :  { %1733 = vmatprep.subr.bf16.mxu1 %v3611_v41  ;;  %v4446_v41 = vpack.c.bf16 %v1838_v33, %v1837_v32  ;;  %v1830_v32 = vld [vmem:[%s4777_s14 + $0x68] sm:$0xff]  ;;  %v4594_v33 = vpack.c.bf16 %v1878_v30, %v1877_v26 }
 0x5fa   :  { %1734 = vmatpush1.bf16.msra.mxu1 %v3609_v42  ;;  %v4448_v42 = vpack.c.bf16 %v1870_v35, %v1869_v34  ;;  %v4596_v34 = vpack.c.bf16 %v1830_v32, %v1829_v31  ;;  %v1861_v35 = vld [vmem:[%s4777_s14 + $0x160] sm:$0xff] }
 0x5fb   :  { %1735 = vmatprep.subr.bf16.mxu1 %v3617_v43  ;;  %v1853_v43 = vld [vmem:[%s4777_s14 + $0x120] sm:$0xff] }
 0x5fe   :  { %1736 = vmatpush1.bf16.msra.mxu1 %v3615_v44  ;;  %v1854_v44 = vld [vmem:[%s4777_s14 + $0x128] sm:$0xff] }
 0x5ff   :  { %1737 = vmatprep.subr.bf16.mxu1 %v3623_v45  ;;  %v1839_v45 = vld [vmem:[%s4777_s14 + $0xb0] sm:$0xff]  ;;  %v4472_v51 = vpack.c.bf16 %v1854_v44, %v1853_v43  ;;  %v1848_v44 = vld [vmem:[%s4777_s14 + $0xf8] sm:$0xff] }
 0x600   :  { %v1847_v43 = vld [vmem:[%s4777_s14 + $0xf0] sm:$0xff] }
 0x602   :  { %1738 = vmatpush1.bf16.msra.mxu1 %v3621_v46  ;;  %v1840_v46 = vld [vmem:[%s4777_s14 + $0xb8] sm:$0xff] }
 0x603   :  { %1739 = vmatprep.subr.bf16.mxu1 %v3629_v47  ;;  %v1871_v47 = vld [vmem:[%s4777_s14 + $0x1b0] sm:$0xff]  ;;  %v4479_v55 = vpack.c.bf16 %v1840_v46, %v1839_v45  ;;  %v4619_v46 = vpack.c.bf16 %v1848_v44, %v1847_v43 }
 0x604   :  { %v1879_v45 = vld [vmem:[%s4777_s14 + $0x1f0] sm:$0xff] }
 0x606   :  { %1740 = vmatpush1.bf16.msra.mxu1 %v3627_v50  ;;  %v4470_v50 = vpack.c.bf16 %v1822_v36, %v1821_v40  ;;  %v1862_v40 = vld [vmem:[%s4777_s14 + $0x168] sm:$0xff] }
 0x607   :  { %1741 = vmatprep.subr.bf16.mxu1 %v3635_v54  ;;  %v1823_v54 = vld [vmem:[%s4777_s14 + $0x30] sm:$0xff]  ;;  %v4605_v36 = vpack.c.bf16 %v1862_v40, %v1861_v35 }
 0x60a   :  { %1742 = vmatpush1.bf16.msra.mxu1 %v3633_v58  ;;  %v4481_v58 = vpack.c.bf16 %v1872_v48, %v1871_v47  ;;  %v1880_v47 = vld [vmem:[%s4777_s14 + $0x1f8] sm:$0xff]  ;;  %v1831_v48 = vld [vmem:[%s4777_s14 + $0x70] sm:$0xff] }
 0x60b   :  { %1743 = vmatprep.subr.bf16.mxu1 %v3641_v0  ;;  %v1855_v0 = vld [vmem:[%s4777_s14 + $0x130] sm:$0xff] }
 0x60c   :  { %v4496_v6 = vpack.c.bf16 %v1856_v2, %v1855_v0  ;;  %v1863_v2 = vld [vmem:[%s4777_s14 + $0x170] sm:$0xff] }
 0x60d   :  { %v4641_v8 = vpack.c.bf16 %v1864_v7, %v1863_v2 }
 0x60e   :  { %1744 = vmatpush1.bf16.msra.mxu1 %v3639_v3  ;;  %v4494_v3 = vpack.c.bf16 %v1824_v63, %v1823_v54  ;;  %v1832_v54 = vld [vmem:[%s4777_s14 + $0x78] sm:$0xff]  ;;  %v4630_v63 = vpack.c.bf16 %v1880_v47, %v1879_v45 }
 0x60f   :  { %3379 = vmatprep.subr.bf16.mxu1 %v4363_v11  ;;  %v4632_v0 = vpack.c.bf16 %v1832_v54, %v1831_v48 }
 0x6c0   :  { %v1445_v14 = vpop.f32.mrb[18].mxu1 }
 0x6c1   :  { %v1525_v49 = vrot.slane %v1445_v14, %v4080_v61  ;;  %v3276_v52 = vpop.f32.mrb[19].mxu1  ;;  %v1825_v14 = vld [vmem:[%s4777_s14 + $0x40] sm:$0xff] }
 0x6c2   :  { %v4522_v52 = vpack.c.bf16 %v1874_v12, %v1873_v9 }
 0x6c3   :  { %v1526_v53 = vmul.f32 %v1525_v49, %v4213_v57  ;;  %v1527_v56 = vmul.f32 %v1525_v49, %v4215_v60  ;;  %v1849_v57 = vld [vmem:[%s4777_s14 + $0x100] sm:$0xff]  ;;  %v1850_v60 = vld [vmem:[%s4777_s14 + $0x108] sm:$0xff] }
 0x6c4   :  { %v1518_v59 = vpop.f32.mrb[20].mxu1  ;;  %v4402_v24 = vpack.c.bf16 %v1850_v60, %v1849_v57  ;;  %v1826_v49 = vld [vmem:[%s4777_s14 + $0x48] sm:$0xff]  ;;  %v1827_v57 = vld [vmem:[%s4777_s14 + $0x50] sm:$0xff]  ;;  %v1828_v60 = vld [vmem:[%s4777_s14 + $0x58] sm:$0xff] }
 0x6c5   :  { %v1531_v39 = vrot.slane %v1518_v59, %v4080_v61  ;;  %v3281_v62 = vpop.f32.mrb[21].mxu1  ;;  %v1858_v59 = vld [vmem:[%s4777_s14 + $0x148] sm:$0xff]  ;;  %v4560_v18 = vpack.c.bf16 %v1828_v60, %v1827_v57 }
 0x6c6   :  { %v1843_v62 = vld [vmem:[%s4777_s14 + $0xd0] sm:$0xff] }
 0x6c7   :  { %v1532_v15 = vadd.f32 %v1531_v39, %v1526_v53  ;;  %v1533_v16 = vadd.f32 %v1531_v39, %v1527_v56  ;;  %v4524_v53 = vpack.c.bf16 %v1826_v49, %v1825_v14  ;;  %v1857_v56 = vld [vmem:[%s4777_s14 + $0x140] sm:$0xff] }
 0x6c8   :  { %v4533_v39 = vpack.c.bf16 %v1858_v59, %v1857_v56 }
 0x6c9   :  { %v1534_v21 = vmax.f32 %v1532_v15, 0.0  ;;  %v1535_v22 = vmax.f32 %v1533_v16, 0.0  ;;  %v4547_v15 = vpack.c.bf16 %v1844_v1, %v1843_v62  ;;  %v1876_v16 = vld [vmem:[%s4777_s14 + $0x1d8] sm:$0xff] }
 0x6ca   :  { %v4558_v17 = vpack.c.bf16 %v1876_v16, %v1875_v4 }
 0x6cb   :  { %v1536_v27 = vpack.c.bf16 %v1535_v22, %v1534_v21  ;;  %v4569_v21 = vpack.c.bf16 %v1860_v20, %v1859_v19  ;;  %v1845_v22 = vld [vmem:[%s4777_s14 + $0xe0] sm:$0xff] }
 0x6cd   :  { %1762 = vmatmul.mubr.bf16.vlgmr.msra.gmra.mrb[24].mxu1 %v1536_v27  ;;  %1805 = vmatmul.mubr.bf16.vlgmr.msra.gmra.mrb[16].mxu0 %v1536_v27  ;;  %v4583_v27 = vpack.c.bf16 %v1846_v25, %v1845_v22 }
 0x6ce   :  { %3381 = vmatpush3.bf16.msra.mxu1 %v4400_v23  ;;  %3413 = vmatpush3.bf16.msra.mxu0 %v4402_v24 }
 0x6cf   :  { %3383 = vmatprep.subr.bf16.mxu1 %v4410_v28  ;;  %3415 = vmatprep.subr.bf16.mxu0 %v4412_v29 }
 0x6d2   :  { %3385 = vmatpush3.bf16.msra.mxu1 %v4434_v37  ;;  %3417 = vmatpush3.bf16.msra.mxu0 %v4436_v38 }
 0x6d3   :  { %3387 = vmatprep.subr.bf16.mxu1 %v4446_v41  ;;  %3419 = vmatprep.subr.bf16.mxu0 %v4448_v42 }
 0x6d6   :  { %3389 = vmatpush3.bf16.msra.mxu1 %v4470_v50  ;;  %3421 = vmatpush3.bf16.msra.mxu0 %v4472_v51 }
 0x6d7   :  { %3391 = vmatprep.subr.bf16.mxu1 %v4479_v55  ;;  %3423 = vmatprep.subr.bf16.mxu0 %v4481_v58 }
 0x6da   :  { %3393 = vmatpush3.bf16.msra.mxu1 %v4494_v3  ;;  %3425 = vmatpush3.bf16.msra.mxu0 %v4496_v6 }
 0x6db   :  { %3395 = vmatprep.subr.bf16.mxu1 %v4511_v10  ;;  %3427 = vmatprep.subr.bf16.mxu0 %v4522_v52 }
 0x6de   :  { %3397 = vmatpush3.bf16.msra.mxu1 %v4524_v53  ;;  %3429 = vmatpush3.bf16.msra.mxu0 %v4533_v39 }
 0x6df   :  { %3399 = vmatprep.subr.bf16.mxu1 %v4547_v15  ;;  %3431 = vmatprep.subr.bf16.mxu0 %v4558_v17 }
 0x6e2   :  { %3401 = vmatpush3.bf16.msra.mxu1 %v4560_v18  ;;  %3433 = vmatpush3.bf16.msra.mxu0 %v4569_v21 }
 0x6e3   :  { %3403 = vmatprep.subr.bf16.mxu1 %v4583_v27  ;;  %3435 = vmatprep.subr.bf16.mxu0 %v4594_v33 }
 0x6e6   :  { %3405 = vmatpush3.bf16.msra.mxu1 %v4596_v34  ;;  %3437 = vmatpush3.bf16.msra.mxu0 %v4605_v36 }
 0x6e7   :  { %3407 = vmatprep.subr.bf16.mxu1 %v4619_v46  ;;  %3439 = vmatprep.subr.bf16.mxu0 %v4630_v63 }
 0x6ea   :  { %3409 = vmatpush3.bf16.msra.mxu1 %v4632_v0  ;;  %3441 = vmatpush3.bf16.msra.mxu0 %v4641_v8 }
 0x6eb   :  { %3443 = vmatprep.subr.bf16.mxu1 %v4363_v11  ;;  %3475 = vmatprep.subr.bf16.mxu0 %v4368_v13 }
 0x7a0   :  { %v4648_v9 = vpop.f32.mrb[24].mxu1  ;;  %v4650_v12 = vpop.f32.mrb[16].mxu0 }
 0x7a1   :  { %4795 = vst [vmem:[#allocation11_spill] sm:$0xff] %v4648_v9  ;;  %4796 = vst [vmem:[#allocation12_spill] sm:$0xff] %v4650_v12  ;;  %v4652_v14 = vpop.f32.mrb[25].mxu1  ;;  %v4654_v49 = vpop.f32.mrb[17].mxu0  ;;  %v1917_v56 = vmul.f32 %v4648_v9, %v4648_v9  ;;  %v1919_v59 = vmul.f32 %v4650_v12, %v4650_v12 }
 0x7a2   :  { %4797 = vst [vmem:[#allocation13_spill] sm:$0xff] %v4652_v14  ;;  %4798 = vst [vmem:[#allocation14_spill] sm:$0xff] %v4654_v49  ;;  %v1918_v62 = vmul.f32 %v4652_v14, %v4652_v14  ;;  %v1920_v11 = vmul.f32 %v4654_v49, %v4654_v49  ;;  %v4664_v13 = vpop.f32.mrb[26].mxu1  ;;  %v4666_v1 = vpop.f32.mrb[18].mxu0 }
 0x7a3   :  { %4799 = vst [vmem:[#allocation15_spill] sm:$0xff] %v4664_v13  ;;  %4800 = vst [vmem:[#allocation16_spill] sm:$0xff] %v4666_v1  ;;  %v1889_v4 = vadd.f32 %v4664_v13, %v4648_v9  ;;  %v1921_v16 = vmul.f32 %v4664_v13, %v4664_v13  ;;  %v1903_v57 = vadd.f32 %v4666_v1, %v4650_v12  ;;  %v4676_v19 = vpop.f32.mrb[27].mxu1  ;;  %v4678_v20 = vpop.f32.mrb[19].mxu0 }
 0x7a4   :  { %v1923_v60 = vmul.f32 %v4666_v1, %v4666_v1  ;;  %4801 = vst [vmem:[#allocation17_spill] sm:$0xff] %v4676_v19  ;;  %4802 = vst [vmem:[#allocation18_spill] sm:$0xff] %v4678_v20  ;;  %v1896_v22 = vadd.f32 %v4676_v19, %v4652_v14  ;;  %v1922_v25 = vmul.f32 %v4676_v19, %v4676_v19 }
 0x7a5   :  { %v1910_v26 = vadd.f32 %v4678_v20, %v4654_v49  ;;  %v1924_v30 = vmul.f32 %v4678_v20, %v4678_v20  ;;  %v1890_v31 = vrot.slane %v1889_v4, 4  ;;  %v1925_v32 = vadd.f32 %v1921_v16, %v1917_v56 }
 0x7a6   :  { %v1904_v35 = vrot.slane %v1903_v57, 4  ;;  %v1939_v40 = vadd.f32 %v1923_v60, %v1919_v59  ;;  %v1897_v43 = vrot.slane %v1896_v22, 4  ;;  %v1932_v44 = vadd.f32 %v1922_v25, %v1918_v62 }
 0x7a7   :  { %v1911_v45 = vrot.slane %v1910_v26, 4  ;;  %v1946_v47 = vadd.f32 %v1924_v30, %v1920_v11  ;;  %v1891_v48 = vadd.f32 %v1890_v31, %v1889_v4 }
 0x7a8   :  { %v1905_v54 = vadd.f32 %v1904_v35, %v1903_v57  ;;  %v1898_v2 = vadd.f32 %v1897_v43, %v1896_v22  ;;  %v1933_v7 = vrot.slane %v1932_v44, 4 }
 0x7a9   :  { %v1912_v5 = vadd.f32 %v1911_v45, %v1910_v26  ;;  %v1947_v1 = vrot.slane %v1946_v47, 4  ;;  %v1892_v12 = vrot.slane %v1891_v48, 2 }
 0x7aa   :  { %v1906_v19 = vrot.slane %v1905_v54, 2  ;;  %v1899_v49 = vrot.slane %v1898_v2, 2  ;;  %v1934_v14 = vadd.f32 %v1933_v7, %v1932_v44  ;;  %v1887_v7 = vld [vmem:[#allocation5 + $0x30] sm:$0xff] }
 0x7ab   :  { %v1913_v13 = vrot.slane %v1912_v5, 2  ;;  %v1948_v20 = vadd.f32 %v1947_v1, %v1946_v47  ;;  %v1893_v9 = vadd.f32 %v1892_v12, %v1891_v48 }
 0x7ac   :  { %v1907_v56 = vadd.f32 %v1906_v19, %v1905_v54  ;;  %v1900_v16 = vadd.f32 %v1899_v49, %v1898_v2  ;;  %v1935_v60 = vrot.slane %v1934_v14, 2  ;;  %v1883_v2 = vld [vmem:[#allocation5 + $0x10] sm:$0xff] }
 0x7ad   :  { %v1914_v59 = vadd.f32 %v1913_v13, %v1912_v5  ;;  %v1949_v62 = vrot.slane %v1948_v20, 2  ;;  %v1894_v25 = vrot.slane %v1893_v9, 1  ;;  %v1926_v5 = vrot.slane %v1925_v32, 4 }
 0x7ae   :  { %v1908_v11 = vrot.slane %v1907_v56, 1  ;;  %v1901_v4 = vrot.slane %v1900_v16, 1  ;;  %v1936_v22 = vadd.f32 %v1935_v60, %v1934_v14 }
 0x7af   :  { %v1915_v57 = vrot.slane %v1914_v59, 1  ;;  %v1950_v30 = vadd.f32 %v1949_v62, %v1948_v20  ;;  %v1895_v45 = vadd.f32 %v1894_v25, %v1893_v9  ;;  %v1816_v25 = vld [vmem:[%s4774_s11] sm:$0x1] }
 0x7b0   :  { %v1902_v26 = vadd.f32 %v1901_v4, %v1900_v16  ;;  %v1937_v35 = vrot.slane %v1936_v22, 1  ;;  %v1909_v44 = vadd.f32 %v1908_v11, %v1907_v56  ;;  %v1815_v56 = vld [vmem:[%s4773_s10] sm:$0x1]  ;;  %s3739_s10 = smov [#allocation7]  }
 0x7b1   :  { %v1916_v31 = vadd.f32 %v1915_v57, %v1914_v59  ;;  %v1951_v43 = vrot.slane %v1950_v30, 1  ;;  %v3512_v59 = vpack.c.bf16 %v1887_v7, %v1883_v2  ;;  %v3656_v2 = vld [vmem:[#allocation2 + $0x30] sm:$0xff]  ;;  %s2610_s11 = sshll.u32 %s3739_s10, 4  ;;  %s2611_s11 = int_to_ptr.vmem [resolvable:$true] %s2610_s11 }
 0x7b2   :  { %2017 = vmatprep.mubr.f32.mxu1 %v1902_v26  ;;  %v1938_v12 = vadd.f32 %v1937_v35, %v1936_v22  ;;  %v4804_v26 = vld [vmem:[#allocation11_spill] sm:$0xff]  ;;  %s3703_s28 = scalar_lea.vmem %s2611_s11, 1024  ;;  %p3708_p3 = scmp.lt.s32.totalorder %s2611_s11, %s2611_s11 }
 0x7b3   :  { %2087 = vmatprep.mubr.f32.mxu0 %v1916_v31  ;;  %v1952_v1 = vadd.f32 %v1951_v43, %v1950_v30  ;;  %2018 = vmatmul.mubr.f32.vlgmr.msra.gmra.mrb[22].mxu1 %v1895_v45  ;;  %v4805_v35 = vld [vmem:[#allocation15_spill] sm:$0xff]  ;;  %v4806_v45 = vld [vmem:[#allocation13_spill] sm:$0xff]  ;;  %p3704_p2 = scmp.ne.s32.totalorder %s2611_s11, %s3703_s28  ;;  %p3709_p4 = scmp.lt.s32.totalorder %s3703_s28, %s3703_s28 }
 0x7b4   :  { %2088 = vmatmul.mubr.f32.vlgmr.msra.gmra.mrb[6].mxu0 %v1909_v44  ;;  %3445 = vmatpush3.bf16.msra.mxu1 %v4400_v23  ;;  %v1940_v23 = vrot.slane %v1939_v40, 4 }
 0x7b5   :  { %3477 = vmatpush3.bf16.msra.mxu0 %v4402_v24  ;;  %2158 = vmatprep.mubr.f32.mxu1 %v1938_v12  ;;  %v1927_v24 = vadd.f32 %v1926_v5, %v1925_v32  ;;  %v4807_v12 = vld [vmem:[#allocation17_spill] sm:$0xff]  ;;  %p3710_p5 = por %p3709_p4, %p3708_p3 }
 0x7b6   :  { %2228 = vmatprep.mubr.f32.mxu0 %v1952_v1  ;;  %3447 = vmatprep.subr.bf16.mxu1 %v4410_v28  ;;  %v1941_v28 = vadd.f32 %v1940_v23, %v1939_v40 }
 0x7b7   :  { %3479 = vmatprep.subr.bf16.mxu0 %v4412_v29  ;;  %v1928_v29 = vrot.slane %v1927_v24, 2  ;;  %p3711_p6 = pnand %p3710_p5, %p3704_p2 }
 0x7b8   :  { %3449 = vmatpush3.bf16.msra.mxu1 %v4434_v37  ;;  %v1942_v37 = vrot.slane %v1941_v28, 2 }
 0x7b9   :  { %3481 = vmatpush3.bf16.msra.mxu0 %v4436_v38  ;;  %3451 = vmatprep.subr.bf16.mxu1 %v4446_v41  ;;  %v1929_v38 = vadd.f32 %v1928_v29, %v1927_v24  ;;  %v4808_v29 = vld [vmem:[#allocation12_spill] sm:$0xff] }
 0x7ba   :  { %3483 = vmatprep.subr.bf16.mxu0 %v4448_v42  ;;  %v1943_v41 = vadd.f32 %v1942_v37, %v1941_v28 }
 0x7bb   :  { %v1930_v42 = vrot.slane %v1929_v38, 1 }
 0x7bc   :  { %3453 = vmatpush3.bf16.msra.mxu1 %v4470_v50  ;;  %v1944_v50 = vrot.slane %v1943_v41, 1 }
 0x7bd   :  { %3485 = vmatpush3.bf16.msra.mxu0 %v4472_v51  ;;  %3455 = vmatprep.subr.bf16.mxu1 %v4479_v55  ;;  %v1931_v51 = vadd.f32 %v1930_v42, %v1929_v38  ;;  %v4809_v38 = vld [vmem:[#allocation16_spill] sm:$0xff]  ;;  %v4810_v42 = vld [vmem:[#allocation14_spill] sm:$0xff] }
 0x7be   :  { %3487 = vmatprep.subr.bf16.mxu0 %v4481_v58  ;;  %v1945_v55 = vadd.f32 %v1944_v50, %v1943_v41  ;;  %v4803_v58 = vmov 0.0  }
 0x7c0   :  { %3457 = vmatpush3.bf16.msra.mxu1 %v4494_v3  ;;  %v1882_v3 = vld [vmem:[#allocation5 + $0x8] sm:$0xff] }
 0x7c1   :  { %3489 = vmatpush3.bf16.msra.mxu0 %v4496_v6  ;;  %3459 = vmatprep.subr.bf16.mxu1 %v4511_v10  ;;  %v1886_v6 = vld [vmem:[#allocation5 + $0x28] sm:$0xff]  ;;  %v1881_v10 = vld [vmem:[#allocation5] sm:$0xff] }
 0x7c2   :  { %3491 = vmatprep.subr.bf16.mxu0 %v4522_v52  ;;  %v3506_v52 = vpack.c.bf16 %v1886_v6, %v1882_v3 }
 0x7c4   :  { %3461 = vmatpush3.bf16.msra.mxu1 %v4524_v53  ;;  %v1885_v53 = vld [vmem:[#allocation5 + $0x20] sm:$0xff] }
 0x7c5   :  { %3493 = vmatpush3.bf16.msra.mxu0 %v4533_v39  ;;  %3463 = vmatprep.subr.bf16.mxu1 %v4547_v15  ;;  %v3508_v39 = vpack.c.bf16 %v1885_v53, %v1881_v10  ;;  %v1884_v15 = vld [vmem:[#allocation5 + $0x18] sm:$0xff] }
 0x7c6   :  { %3495 = vmatprep.subr.bf16.mxu0 %v4558_v17  ;;  %v1888_v17 = vld [vmem:[#allocation5 + $0x38] sm:$0xff] }
 0x7c8   :  { %3465 = vmatpush3.bf16.msra.mxu1 %v4560_v18  ;;  %v3510_v18 = vpack.c.bf16 %v1888_v17, %v1884_v15 }
 0x7c9   :  { %3497 = vmatpush3.bf16.msra.mxu0 %v4569_v21  ;;  %3467 = vmatprep.subr.bf16.mxu1 %v4583_v27 }
 0x7ca   :  { %3499 = vmatprep.subr.bf16.mxu0 %v4594_v33 }
 0x7cc   :  { %3469 = vmatpush3.bf16.msra.mxu1 %v4596_v34 }
 0x7cd   :  { %3501 = vmatpush3.bf16.msra.mxu0 %v4605_v36  ;;  %3471 = vmatprep.subr.bf16.mxu1 %v4619_v46 }
 0x7ce   :  { %3503 = vmatprep.subr.bf16.mxu0 %v4630_v63 }
 0x7d0   :  { %3473 = vmatpush3.bf16.msra.mxu1 %v4632_v0 }
 0x7d1   :  { %3505 = vmatpush3.bf16.msra.mxu0 %v4641_v8  ;;  %3507 = vmatprep.subr.bf16.mxu1 %v3506_v52 }
 0x7d3   :  { %2159 = vmatmul.mubr.f32.vlgmr.msra.gmra.mrb[28].mxu1 %v1931_v51  ;;  %v4811_v51 = vld [vmem:[#allocation18_spill] sm:$0xff] }
 0x7d4   :  { %2229 = vmatmul.mubr.f32.vlgmr.msra.gmra.mrb[20].mxu0 %v1945_v55  ;;  %2310 = vmatprep.mubr.f32.mxu1 %v4803_v58 }
 0x7d5   :  { %3509 = vmatpush1.bf16.msra.mxu1 %v3508_v39 }
 0x7d6   :  { %3511 = vmatprep.subr.bf16.mxu1 %v3510_v18 }
 0x886   :  { %v2942_v21 = vpop.f32.mrb[22].mxu1 }
 0x887   :  { %v2977_v27 = vpop.f32.mrb[6].mxu0  ;;  %v2943_v33 = vpop.f32.mrb[23].mxu1 }
 0x888   :  { %v2978_v34 = vpop.f32.mrb[7].mxu0  ;;  %v2944_v36 = vadd.f32 %v2943_v33, %v2942_v21 }
 0x889   :  { %v2979_v46 = vadd.f32 %v2978_v34, %v2977_v27  ;;  %v3652_v27 = vld [vmem:[#allocation2 + $0x20] sm:$0xff] }
 0x88b   :  { %v2090_v63 = vadd.f32 %v2979_v46, %v2944_v36  ;;  %v3653_v46 = vld [vmem:[#allocation2 + $0x8] sm:$0xff] }
 0x88d   :  { %v2093_v49 = vmul.f32 0.001953125, %v2090_v63 }
 0x88f   :  { %v2235_v32 = vmul.f32 %v2093_v49, %v2093_v49 }
 0x8a6   :  { %v3012_v0 = vpop.f32.mrb[28].mxu1 }
 0x8a7   :  { %v3047_v8 = vpop.f32.mrb[20].mxu0  ;;  %v3013_v9 = vpop.f32.mrb[29].mxu1 }
 0x8a8   :  { %v3048_v14 = vpop.f32.mrb[21].mxu0  ;;  %v3014_v13 = vadd.f32 %v3013_v9, %v3012_v0  ;;  %v3654_v0 = vld [vmem:[#allocation2 + $0x28] sm:$0xff] }
 0x8a9   :  { %v3049_v19 = vadd.f32 %v3048_v14, %v3047_v8 }
 0x8ab   :  { %v2231_v20 = vadd.f32 %v3049_v19, %v3014_v13 }
 0x8ad   :  { %v2234_v40 = vmul.f32 0.001953125, %v2231_v20 }
 0x8af   :  { %v2236_v47 = vsub.f32 %v2234_v40, %v2235_v32 }
 0x8b1   :  { %v2237_v48 = vmax.f32 %v2236_v47, 0.0 }
 0x8b3   :  { %v2238_v54 = vadd.f32 1e-05, %v2237_v48  ;;  %v3655_v48 = vld [vmem:[#allocation2 + $0x10] sm:$0xff] }
 0x8b5   :  { %3649 = vrsqrt.f32 %v2238_v54 }
 0x8bf   :  { %v3650_v16 = vpop.eup %3649 }
 0x8c0   :  { %v2240_v60 = vmul.f32 %v3650_v16, %v1815_v56  ;;  %v3657_v56 = vld [vmem:[#allocation2 + $0x18] sm:$0xff] }
 0x8c1   :  { %v3658_v16 = vld [vmem:[#allocation2 + $0x38] sm:$0xff] }
 0x8c2   :  { %2755 = vmatmul.mubr.msk.f32.vlgmr.msra.gmra.mrb[30].mxu1 %vm791_vm3, %v2240_v60  ;;  %v2241_v62 = vmul.f32 %v2240_v60, %v2093_v49 }
 0x8c3   :  { %3513 = vmatpush1.bf16.msra.mxu1 %v3512_v59  ;;  %2381 = vmatprep.mubr.f32.mxu1 %v4803_v58 }
 0x8c4   :  { %3515 = vmatprep.subr.bf16.mxu1 %v3506_v52  ;;  %v2242_v11 = vsub.f32 %v1816_v25, %v2241_v62 }
 0x8c6   :  { %2756 = vmatmul.mubr.msk.f32.vlgmr.msra.gmra.mrb[32].mxu1 %vm791_vm3, %v2240_v60 }
 0x8c7   :  { %3517 = vmatpush1.bf16.msra.mxu1 %v3508_v39  ;;  %2455 = vmatprep.mubr.f32.mxu1 %v4803_v58 }
 0x8c8   :  { %3519 = vmatprep.subr.bf16.mxu1 %v3510_v18  ;;  %v3651_v18 = vld [vmem:[#allocation2] sm:$0xff] }
 0x8ca   :  { %2757 = vmatmul.mubr.msk.f32.vlgmr.msra.gmra.mrb[34].mxu1 %vm791_vm3, %v2242_v11 }
 0x8cb   :  { %3521 = vmatpush1.bf16.msra.mxu1 %v3512_v59  ;;  %2526 = vmatprep.mubr.f32.mxu1 %v4803_v58 }
 0x8ce   :  { %2758 = vmatmul.mubr.msk.f32.vlgmr.msra.gmra.mrb[36].mxu1 %vm791_vm3, %v2242_v11 }
 0x995   :  { %v2312_v4 = vpop.f32.mrb[30].mxu1 }
 0x996   :  { %v2536_v57 = vrot.slane %v2312_v4, %v4080_v61  ;;  %v2314_v22 = vpop.f32.mrb[31].mxu1 }
 0x997   :  { %v2540_v30 = vrot.slane %v2314_v22, %v4080_v61 }
 0x998   :  { %v2549_v31 = vmul.f32 %v2536_v57, %v4804_v26  ;;  %v2553_v43 = vmul.f32 %v2536_v57, %v4805_v35 }
 0x999   :  { %v2550_v44 = vmul.f32 %v2540_v30, %v4806_v45  ;;  %v2554_v1 = vmul.f32 %v2540_v30, %v4807_v12  ;;  %v2383_v5 = vpop.f32.mrb[32].mxu1 }
 0x99a   :  { %v2544_v23 = vrot.slane %v2383_v5, %v4080_v61  ;;  %v2385_v24 = vpop.f32.mrb[33].mxu1 }
 0x99b   :  { %v2548_v28 = vrot.slane %v2385_v24, %v4080_v61 }
 0x99c   :  { %v2551_v37 = vmul.f32 %v2544_v23, %v4808_v29  ;;  %v2555_v41 = vmul.f32 %v2544_v23, %v4809_v38 }
 0x99d   :  { %v2552_v50 = vmul.f32 %v2548_v28, %v4810_v42  ;;  %v2556_v55 = vmul.f32 %v2548_v28, %v4811_v51  ;;  %v2457_v58 = vpop.f32.mrb[34].mxu1 }
 0x99e   :  { %v2560_v3 = vrot.slane %v2457_v58, %v4080_v61  ;;  %v2459_v6 = vpop.f32.mrb[35].mxu1 }
 0x99f   :  { %v2564_v10 = vrot.slane %v2459_v6, %v4080_v61 }
 0x9a0   :  { %v2573_v52 = vadd.f32 %v2560_v3, %v2549_v31  ;;  %v2577_v53 = vadd.f32 %v2560_v3, %v2553_v43 }
 0x9a1   :  { %v2574_v39 = vadd.f32 %v2564_v10, %v2550_v44  ;;  %v2578_v15 = vadd.f32 %v2564_v10, %v2554_v1  ;;  %v2528_v17 = vpop.f32.mrb[36].mxu1 }
 0x9a2   :  { %v2581_v21 = vadd.f32 %v3651_v18, %v2573_v52  ;;  %v2585_v33 = vadd.f32 %v3652_v27, %v2577_v53  ;;  %v2568_v34 = vrot.slane %v2528_v17, %v4080_v61  ;;  %v2530_v36 = vpop.f32.mrb[37].mxu1 }
 0x9a3   :  { %v2582_v63 = vadd.f32 %v3653_v46, %v2574_v39  ;;  %v2586_v8 = vadd.f32 %v3654_v0, %v2578_v15  ;;  %v2572_v9 = vrot.slane %v2530_v36, %v4080_v61 }
 0x9a4   :  { %v2589_v14 = vmax.f32 %v2581_v21, 0.0  ;;  %v2593_v49 = vmax.f32 %v2585_v33, 0.0  ;;  %v2575_v13 = vadd.f32 %v2568_v34, %v2551_v37  ;;  %v2579_v19 = vadd.f32 %v2568_v34, %v2555_v41 }
 0x9a5   :  { %v2590_v20 = vmax.f32 %v2582_v63, 0.0  ;;  %v2594_v32 = vmax.f32 %v2586_v8, 0.0  ;;  %v2576_v40 = vadd.f32 %v2572_v9, %v2552_v50  ;;  %v2580_v47 = vadd.f32 %v2572_v9, %v2556_v55 }
 0x9a6   :  { %2597 = vst [vmem:[#allocation7] sm:$0xff] %v2589_v14  ;;  %2601 = vst [vmem:[#allocation7 + $0x20] sm:$0xff] %v2593_v49  ;;  %v2583_v54 = vadd.f32 %v3655_v48, %v2575_v13  ;;  %v2587_v7 = vadd.f32 %v3656_v2, %v2579_v19 }
 0x9a7   :  { %2598 = vst [vmem:[#allocation7 + $0x8] sm:$0xff] %v2590_v20  ;;  %2602 = vst [vmem:[#allocation7 + $0x28] sm:$0xff] %v2594_v32  ;;  %v2584_v61 = vadd.f32 %v3657_v56, %v2576_v40  ;;  %v2588_v59 = vadd.f32 %v3658_v16, %v2580_v47 }
 0x9a8   :  { %v2591_v60 = vmax.f32 %v2583_v54, 0.0  ;;  %v2595_v62 = vmax.f32 %v2587_v7, 0.0 }
 0x9a9   :  { %v2592_v25 = vmax.f32 %v2584_v61, 0.0  ;;  %v2596_v11 = vmax.f32 %v2588_v59, 0.0 }
 0x9aa   :  { %2599 = vst [vmem:[#allocation7 + $0x10] sm:$0xff] %v2591_v60  ;;  %2603 = vst [vmem:[#allocation7 + $0x30] sm:$0xff] %v2595_v62 }
 0x9ab   :  { %2600 = vst [vmem:[#allocation7 + $0x18] sm:$0xff] %v2592_v25  ;;  %2604 = vst [vmem:[#allocation7 + $0x38] sm:$0xff] %v2596_v11 }
 0x9ac   :  { %3714 = shalt.err (!%p3711_p6)
}
 0x9ad   :  { %s4812_s30 = sld [smem:[#allocation20_spill]] }
 0x9b3   :  { %s3715_s2 = scalar_lea.hbm %s4812_s30, 1024 }
 0x9b4   :  { %p3716_p7 = scmp.ne.s32.totalorder %s4812_s30, %s3715_s2  ;;  %p3719_p8 = scmp.lt.u32.totalorder %s3715_s2, %s4812_s30 }
 0x9b6   :  { %p3721_p9 = pnand %p3719_p8, %p3716_p7 }
 0x9b8   :  { %3724 = shalt.err (!%p3721_p9)
}
 0x9b9   :  { %2616 = dma.vmem_to_hbm [thread:$0]  %s2611_s11, 1024, %s4812_s30, [#allocation4], %s3732_s17, %s3732_s17, %s3733_s18  }
 0x9ba   :  { %3729 = dma.done.wait [#allocation4], 1024  }
 0x9bb   :  { %3730 = vsyncadd [#allocation4], 4294966272 }
 0x9bc   :  { %2620 = vsyncpa [#allocation3], 1 }
 0x9bd   :  { %2621 = vsyncpa [#allocation6], 1 }
 0x9be   :  { %2622 = vsyncpa [#allocation4], 1 }

</bundles_post_ra>
